<compile_context>
chip_gen: v7x
topology: tpu7x:2x2x1
jax: 0.10.0
libtpu: 0.0.40
codegen_flags: <defaults>
</compile_context>

<pallas_src>
import functools
import math

import jax
import jax.numpy as jnp
import numpy as np
from jax.experimental import pallas as pl
from jax.experimental.pallas import tpu as pltpu


# --------------------------------------------------------------------------- #
# Pallas kernel
# --------------------------------------------------------------------------- #
def _spatial_attention_kernel(w_ref, x_ref, o_ref, avg_s, max_s, *, K, pad, H, W):
    """Fused channel mean/max + zero-padded KxK conv (2->1 ch) + sigmoid.

    w_ref : (2*K*K,) f32 SMEM, layout [cin, kh, kw] row-major (cin0=avg, cin1=max)
    x_ref : (Nb, C, H, W) f32 VMEM block (UNPADDED input)
    o_ref : (Nb, 1, H, W) f32 VMEM block
    avg_s, max_s : (H+2*pad, W+2*pad) f32 VMEM scratch (zero border = conv pad)
    """
    Nb, C = x_ref.shape[0], x_ref.shape[1]

    # Zero the padded pooled-feature scratch once per grid step.  Only the
    # interior is rewritten per image below, so the border stays zero and acts
    # as the conv's zero padding (exact algebraic refactor of padding the
    # pooled 2-channel map).
    avg_s[...] = jnp.zeros_like(avg_s)
    max_s[...] = jnp.zeros_like(max_s)

    for b in range(Nb):
        # ---- channel mean / max (VPU, unrolled over C) ---------------------
        s = x_ref[b, 0]
        m = x_ref[b, 0]
        for c in range(1, C):
            xc = x_ref[b, c]
            s = s + xc
            m = jnp.maximum(m, xc)
        avg_s[pad:pad + H, pad:pad + W] = s / C      # matches torch.mean
        max_s[pad:pad + H, pad:pad + W] = m

        # ---- 2->1 channel KxK cross-correlation, unrolled scalar MACs ------
        acc = jnp.zeros((H, W), jnp.float32)
        for ci, feat in enumerate((avg_s, max_s)):    # cin: 0 = avg, 1 = max
            for i in range(K):
                for j in range(K):
                    wv = w_ref[ci * K * K + i * K + j]     # scalar from SMEM
                    acc = acc + wv * feat[i:i + H, j:j + W]

        # ---- sigmoid (exp on EUP) ------------------------------------------
        o_ref[b, 0] = 1.0 / (1.0 + jnp.exp(-acc))


# --------------------------------------------------------------------------- #
# Wrapper helpers
# --------------------------------------------------------------------------- #
def _pick_batch_block(N, bytes_per_image, target_bytes=2 << 20):
    """Largest Nb dividing N with block <= ~target bytes, keeping >=2 grid
    steps when N >= 2 (so both v7x TensorCores receive work)."""
    nb = 1
    for cand in range(1, N + 1):
        if N % cand:
            continue
        if cand > 1 and cand * bytes_per_image > target_bytes:
            continue
        if cand > 1 and (N // cand) < 2:
            continue
        nb = cand
    return nb


def _padded_tile_bytes(shape, itemsize=4):
    """VMEM footprint of a block: last two dims padded to (8, 128) tiles."""
    s = list(shape)
    s[-1] = max(128, math.ceil(s[-1] / 128) * 128)
    if len(s) >= 2:
        s[-2] = max(8, math.ceil(s[-2] / 8) * 8)
    n = 1
    for d in s:
        n *= d
    return n * itemsize


# --------------------------------------------------------------------------- #
# Wrapper
# --------------------------------------------------------------------------- #
def spatial_attention(x_nchw, weight):
    """x_nchw: (N, C, H, W); weight: (1, 2, K, K), K in {3, 7}."""
    N, C, H, W = x_nchw.shape
    K = weight.shape[-1]
    assert K in (3, 7), "kernel size must be 3 or 7"
    pad = K // 2
    Hp, Wp = H + 2 * pad, W + 2 * pad

    x = x_nchw.astype(jnp.float32)
    w_flat = weight.astype(jnp.float32).reshape(-1)          # (2*K*K,)

    Nb = _pick_batch_block(N, C * H * W * 4)
    grid = (N // Nb,)

    # Explicit VMEM budget: double-buffered in/out blocks + scratch + margin.
    in_bytes = _padded_tile_bytes((Nb, C, H, W))
    out_bytes = _padded_tile_bytes((Nb, 1, H, W))
    scratch_bytes = 2 * _padded_tile_bytes((Hp, Wp))
    vmem_need = 2 * (in_bytes + out_bytes) + scratch_bytes
    vmem_limit = min(max(int(vmem_need * 1.5) + (1 << 20), 16 << 20), 64 << 20)

    kernel = functools.partial(_spatial_attention_kernel, K=K, pad=pad, H=H, W=W)
    return pl.pallas_call(
        kernel,
        out_shape=jax.ShapeDtypeStruct((N, 1, H, W), jnp.float32),
        grid=grid,
        in_specs=[
            pl.BlockSpec(memory_space=pltpu.MemorySpace.SMEM),     # conv weights
            pl.BlockSpec((Nb, C, H, W), lambda n: (n, 0, 0, 0)),   # unpadded input
        ],
        out_specs=pl.BlockSpec((Nb, 1, H, W), lambda n: (n, 0, 0, 0)),
        scratch_shapes=[pltpu.VMEM((Hp, Wp), jnp.float32),
                        pltpu.VMEM((Hp, Wp), jnp.float32)],
        compiler_params=pltpu.CompilerParams(
            dimension_semantics=("parallel",),
            vmem_limit_bytes=vmem_limit),
    )(w_flat, x)


# --------------------------------------------------------------------------- #
# Pure-JAX reference (for correctness check)
# --------------------------------------------------------------------------- #
def spatial_attention_ref(x, weight):
    avg = jnp.mean(x, axis=1, keepdims=True)
    mx = jnp.max(x, axis=1, keepdims=True)
    feat = jnp.concatenate([avg, mx], axis=1)
    K = weight.shape[-1]
    pad = K // 2
    out = jax.lax.conv_general_dilated(
        feat, weight, (1, 1), [(pad, pad), (pad, pad)],
        dimension_numbers=("NCHW", "OIHW", "NCHW"),
        precision=jax.lax.Precision.HIGHEST)
    return jax.nn.sigmoid(out)


# --------------------------------------------------------------------------- #
if __name__ == "__main__":
    key = jax.random.PRNGKey(0)
    kx, k7, k3 = jax.random.split(key, 3)

    N, C, H, W = 2, 4, 16, 16
    x = jax.random.normal(kx, (N, C, H, W), jnp.float32)      # NCHW input

    fn = jax.jit(spatial_attention)
    for kk, ksize in ((k7, 7), (k3, 3)):                      # both supported sizes
        weight = jax.random.normal(kk, (1, 2, ksize, ksize), jnp.float32)
        weight = weight / np.sqrt(2.0 * ksize * ksize)

        out = jax.block_until_ready(fn(x, weight))
        ref = spatial_attention_ref(x, weight)
        assert out.shape == (N, 1, H, W)
        np.testing.assert_allclose(np.asarray(out), np.asarray(ref),
                                   rtol=1e-4, atol=1e-4)

    print("KERNEL_OK")
</pallas_src>

<mosaic_0001>
module attributes {stable_mosaic.version = 11 : i64} {
  func.func @_spatial_attention_kernel(%arg0: i32, %arg1: memref<98xf32, #tpu.memory_space<smem>>, %arg2: memref<1x4x16x16xf32, #tpu.memory_space<vmem>>, %arg3: memref<1x1x16x16xf32, #tpu.memory_space<vmem>>, %arg4: memref<22x22xf32, #tpu.memory_space<vmem>>, %arg5: memref<22x22xf32, #tpu.memory_space<vmem>>) attributes {dimension_semantics = [#tpu.dimension_semantics<parallel>], iteration_bounds = array<i64: 2>, scalar_prefetch = 0 : i64, scratch_operands = 2 : i64, tpu.core_type = #tpu.core_type<tc>, window_params = [{transform_indices = @transform_0, window_bounds = array<i64: 98>}, {transform_indices = @transform_1, window_bounds = array<i64: 1, 4, 16, 16>}, {transform_indices = @transform_2, window_bounds = array<i64: 1, 1, 16, 16>}]} {
    %cst = arith.constant 0.000000e+00 : f32
    %0 = vector.broadcast %cst : f32 to vector<22x22xf32>
    %c0 = arith.constant 0 : index
    %c0_0 = arith.constant 0 : index
    %1 = vector.load %arg4[%c0, %c0_0] : memref<22x22xf32, #tpu.memory_space<vmem>>, vector<22x22xf32>
    tpu.vector_store %arg4[%c0, %c0_0], %0 {strides = array<i32>} : memref<22x22xf32, #tpu.memory_space<vmem>>, vector<22x22xf32>,
    %cst_1 = arith.constant 0.000000e+00 : f32
    %2 = vector.broadcast %cst_1 : f32 to vector<22x22xf32>
    %c0_2 = arith.constant 0 : index
    %c0_3 = arith.constant 0 : index
    %3 = vector.load %arg5[%c0_2, %c0_3] : memref<22x22xf32, #tpu.memory_space<vmem>>, vector<22x22xf32>
    tpu.vector_store %arg5[%c0_2, %c0_3], %2 {strides = array<i32>} : memref<22x22xf32, #tpu.memory_space<vmem>>, vector<22x22xf32>,
    %c0_4 = arith.constant 0 : index
    %c0_5 = arith.constant 0 : index
    %c0_6 = arith.constant 0 : index
    %c0_7 = arith.constant 0 : index
    %4 = vector.load %arg2[%c0_4, %c0_5, %c0_6, %c0_7] : memref<1x4x16x16xf32, #tpu.memory_space<vmem>>, vector<1x1x16x16xf32>
    %5 = vector.shape_cast %4 : vector<1x1x16x16xf32> to vector<16x16xf32>
    %c0_8 = arith.constant 0 : index
    %c0_9 = arith.constant 0 : index
    %c0_10 = arith.constant 0 : index
    %c0_11 = arith.constant 0 : index
    %6 = vector.load %arg2[%c0_8, %c0_9, %c0_10, %c0_11] : memref<1x4x16x16xf32, #tpu.memory_space<vmem>>, vector<1x1x16x16xf32>
    %7 = vector.shape_cast %6 : vector<1x1x16x16xf32> to vector<16x16xf32>
    %c0_12 = arith.constant 0 : index
    %c1 = arith.constant 1 : index
    %c0_13 = arith.constant 0 : index
    %c0_14 = arith.constant 0 : index
    %8 = vector.load %arg2[%c0_12, %c1, %c0_13, %c0_14] : memref<1x4x16x16xf32, #tpu.memory_space<vmem>>, vector<1x1x16x16xf32>
    %9 = vector.shape_cast %8 : vector<1x1x16x16xf32> to vector<16x16xf32>
    %10 = arith.addf %5, %9 : vector<16x16xf32>
    %11 = arith.maximumf %7, %9 : vector<16x16xf32>
    %c0_15 = arith.constant 0 : index
    %c2 = arith.constant 2 : index
    %c0_16 = arith.constant 0 : index
    %c0_17 = arith.constant 0 : index
    %12 = vector.load %arg2[%c0_15, %c2, %c0_16, %c0_17] : memref<1x4x16x16xf32, #tpu.memory_space<vmem>>, vector<1x1x16x16xf32>
    %13 = vector.shape_cast %12 : vector<1x1x16x16xf32> to vector<16x16xf32>
    %14 = arith.addf %10, %13 : vector<16x16xf32>
    %15 = arith.maximumf %11, %13 : vector<16x16xf32>
    %c0_18 = arith.constant 0 : index
    %c3 = arith.constant 3 : index
    %c0_19 = arith.constant 0 : index
    %c0_20 = arith.constant 0 : index
    %16 = vector.load %arg2[%c0_18, %c3, %c0_19, %c0_20] : memref<1x4x16x16xf32, #tpu.memory_space<vmem>>, vector<1x1x16x16xf32>
    %17 = vector.shape_cast %16 : vector<1x1x16x16xf32> to vector<16x16xf32>
    %18 = arith.addf %14, %17 : vector<16x16xf32>
    %19 = arith.maximumf %15, %17 : vector<16x16xf32>
    %cst_21 = arith.constant 4.000000e+00 : f32
    %20 = vector.broadcast %cst_21 : f32 to vector<16x16xf32>
    %21 = arith.divf %18, %20 : vector<16x16xf32>
    %c3_22 = arith.constant 3 : index
    %c3_23 = arith.constant 3 : index
    %22 = vector.load %arg4[%c3_22, %c3_23] : memref<22x22xf32, #tpu.memory_space<vmem>>, vector<16x16xf32>
    tpu.vector_store %arg4[%c3_22, %c3_23], %21 {strides = array<i32>} : memref<22x22xf32, #tpu.memory_space<vmem>>, vector<16x16xf32>,
    %c3_24 = arith.constant 3 : index
    %c3_25 = arith.constant 3 : index
    %23 = vector.load %arg5[%c3_24, %c3_25] : memref<22x22xf32, #tpu.memory_space<vmem>>, vector<16x16xf32>
    tpu.vector_store %arg5[%c3_24, %c3_25], %19 {strides = array<i32>} : memref<22x22xf32, #tpu.memory_space<vmem>>, vector<16x16xf32>,
    %cst_26 = arith.constant 0.000000e+00 : f32
    %24 = vector.broadcast %cst_26 : f32 to vector<16x16xf32>
    %c0_27 = arith.constant 0 : index
    %25 = memref.load %arg1[%c0_27] : memref<98xf32, #tpu.memory_space<smem>>
    %c0_28 = arith.constant 0 : index
    %c0_29 = arith.constant 0 : index
    %26 = vector.load %arg4[%c0_28, %c0_29] : memref<22x22xf32, #tpu.memory_space<vmem>>, vector<16x16xf32>
    %27 = vector.broadcast %25 : f32 to vector<16x16xf32>
    %28 = arith.mulf %27, %26 : vector<16x16xf32>
    %29 = arith.addf %24, %28 : vector<16x16xf32>
    %c1_30 = arith.constant 1 : index
    %30 = memref.load %arg1[%c1_30] : memref<98xf32, #tpu.memory_space<smem>>
    %c0_31 = arith.constant 0 : index
    %c1_32 = arith.constant 1 : index
    %31 = vector.load %arg4[%c0_31, %c1_32] : memref<22x22xf32, #tpu.memory_space<vmem>>, vector<16x16xf32>
    %32 = vector.broadcast %30 : f32 to vector<16x16xf32>
    %33 = arith.mulf %32, %31 : vector<16x16xf32>
    %34 = arith.addf %29, %33 : vector<16x16xf32>
    %c2_33 = arith.constant 2 : index
    %35 = memref.load %arg1[%c2_33] : memref<98xf32, #tpu.memory_space<smem>>
    %c0_34 = arith.constant 0 : index
    %c2_35 = arith.constant 2 : index
    %36 = vector.load %arg4[%c0_34, %c2_35] : memref<22x22xf32, #tpu.memory_space<vmem>>, vector<16x16xf32>
    %37 = vector.broadcast %35 : f32 to vector<16x16xf32>
    %38 = arith.mulf %37, %36 : vector<16x16xf32>
    %39 = arith.addf %34, %38 : vector<16x16xf32>
    %c3_36 = arith.constant 3 : index
    %40 = memref.load %arg1[%c3_36] : memref<98xf32, #tpu.memory_space<smem>>
    %c0_37 = arith.constant 0 : index
    %c3_38 = arith.constant 3 : index
    %41 = vector.load %arg4[%c0_37, %c3_38] : memref<22x22xf32, #tpu.memory_space<vmem>>, vector<16x16xf32>
    %42 = vector.broadcast %40 : f32 to vector<16x16xf32>
    %43 = arith.mulf %42, %41 : vector<16x16xf32>
    %44 = arith.addf %39, %43 : vector<16x16xf32>
    %c4 = arith.constant 4 : index
    %45 = memref.load %arg1[%c4] : memref<98xf32, #tpu.memory_space<smem>>
    %c0_39 = arith.constant 0 : index
    %c4_40 = arith.constant 4 : index
    %46 = vector.load %arg4[%c0_39, %c4_40] : memref<22x22xf32, #tpu.memory_space<vmem>>, vector<16x16xf32>
    %47 = vector.broadcast %45 : f32 to vector<16x16xf32>
    %48 = arith.mulf %47, %46 : vector<16x16xf32>
    %49 = arith.addf %44, %48 : vector<16x16xf32>
    %c5 = arith.constant 5 : index
    %50 = memref.load %arg1[%c5] : memref<98xf32, #tpu.memory_space<smem>>
    %c0_41 = arith.constant 0 : index
    %c5_42 = arith.constant 5 : index
    %51 = vector.load %arg4[%c0_41, %c5_42] : memref<22x22xf32, #tpu.memory_space<vmem>>, vector<16x16xf32>
    %52 = vector.broadcast %50 : f32 to vector<16x16xf32>
    %53 = arith.mulf %52, %51 : vector<16x16xf32>
    %54 = arith.addf %49, %53 : vector<16x16xf32>
    %c6 = arith.constant 6 : index
    %55 = memref.load %arg1[%c6] : memref<98xf32, #tpu.memory_space<smem>>
    %c0_43 = arith.constant 0 : index
    %c6_44 = arith.constant 6 : index
    %56 = vector.load %arg4[%c0_43, %c6_44] : memref<22x22xf32, #tpu.memory_space<vmem>>, vector<16x16xf32>
    %57 = vector.broadcast %55 : f32 to vector<16x16xf32>
    %58 = arith.mulf %57, %56 : vector<16x16xf32>
    %59 = arith.addf %54, %58 : vector<16x16xf32>
    %c7 = arith.constant 7 : index
    %60 = memref.load %arg1[%c7] : memref<98xf32, #tpu.memory_space<smem>>
    %c1_45 = arith.constant 1 : index
    %c0_46 = arith.constant 0 : index
    %61 = vector.load %arg4[%c1_45, %c0_46] : memref<22x22xf32, #tpu.memory_space<vmem>>, vector<16x16xf32>
    %62 = vector.broadcast %60 : f32 to vector<16x16xf32>
    %63 = arith.mulf %62, %61 : vector<16x16xf32>
    %64 = arith.addf %59, %63 : vector<16x16xf32>
    %c8 = arith.constant 8 : index
    %65 = memref.load %arg1[%c8] : memref<98xf32, #tpu.memory_space<smem>>
    %c1_47 = arith.constant 1 : index
    %c1_48 = arith.constant 1 : index
    %66 = vector.load %arg4[%c1_47, %c1_48] : memref<22x22xf32, #tpu.memory_space<vmem>>, vector<16x16xf32>
    %67 = vector.broadcast %65 : f32 to vector<16x16xf32>
    %68 = arith.mulf %67, %66 : vector<16x16xf32>
    %69 = arith.addf %64, %68 : vector<16x16xf32>
    %c9 = arith.constant 9 : index
    %70 = memref.load %arg1[%c9] : memref<98xf32, #tpu.memory_space<smem>>
    %c1_49 = arith.constant 1 : index
    %c2_50 = arith.constant 2 : index
    %71 = vector.load %arg4[%c1_49, %c2_50] : memref<22x22xf32, #tpu.memory_space<vmem>>, vector<16x16xf32>
    %72 = vector.broadcast %70 : f32 to vector<16x16xf32>
    %73 = arith.mulf %72, %71 : vector<16x16xf32>
    %74 = arith.addf %69, %73 : vector<16x16xf32>
    %c10 = arith.constant 10 : index
    %75 = memref.load %arg1[%c10] : memref<98xf32, #tpu.memory_space<smem>>
    %c1_51 = arith.constant 1 : index
    %c3_52 = arith.constant 3 : index
    %76 = vector.load %arg4[%c1_51, %c3_52] : memref<22x22xf32, #tpu.memory_space<vmem>>, vector<16x16xf32>
    %77 = vector.broadcast %75 : f32 to vector<16x16xf32>
    %78 = arith.mulf %77, %76 : vector<16x16xf32>
    %79 = arith.addf %74, %78 : vector<16x16xf32>
    %c11 = arith.constant 11 : index
    %80 = memref.load %arg1[%c11] : memref<98xf32, #tpu.memory_space<smem>>
    %c1_53 = arith.constant 1 : index
    %c4_54 = arith.constant 4 : index
    %81 = vector.load %arg4[%c1_53, %c4_54] : memref<22x22xf32, #tpu.memory_space<vmem>>, vector<16x16xf32>
    %82 = vector.broadcast %80 : f32 to vector<16x16xf32>
    %83 = arith.mulf %82, %81 : vector<16x16xf32>
    %84 = arith.addf %79, %83 : vector<16x16xf32>
    %c12 = arith.constant 12 : index
    %85 = memref.load %arg1[%c12] : memref<98xf32, #tpu.memory_space<smem>>
    %c1_55 = arith.constant 1 : index
    %c5_56 = arith.constant 5 : index
    %86 = vector.load %arg4[%c1_55, %c5_56] : memref<22x22xf32, #tpu.memory_space<vmem>>, vector<16x16xf32>
    %87 = vector.broadcast %85 : f32 to vector<16x16xf32>
    %88 = arith.mulf %87, %86 : vector<16x16xf32>
    %89 = arith.addf %84, %88 : vector<16x16xf32>
    %c13 = arith.constant 13 : index
    %90 = memref.load %arg1[%c13] : memref<98xf32, #tpu.memory_space<smem>>
    %c1_57 = arith.constant 1 : index
    %c6_58 = arith.constant 6 : index
    %91 = vector.load %arg4[%c1_57, %c6_58] : memref<22x22xf32, #tpu.memory_space<vmem>>, vector<16x16xf32>
    %92 = vector.broadcast %90 : f32 to vector<16x16xf32>
    %93 = arith.mulf %92, %91 : vector<16x16xf32>
    %94 = arith.addf %89, %93 : vector<16x16xf32>
    %c14 = arith.constant 14 : index
    %95 = memref.load %arg1[%c14] : memref<98xf32, #tpu.memory_space<smem>>
    %c2_59 = arith.constant 2 : index
    %c0_60 = arith.constant 0 : index
    %96 = vector.load %arg4[%c2_59, %c0_60] : memref<22x22xf32, #tpu.memory_space<vmem>>, vector<16x16xf32>
    %97 = vector.broadcast %95 : f32 to vector<16x16xf32>
    %98 = arith.mulf %97, %96 : vector<16x16xf32>
    %99 = arith.addf %94, %98 : vector<16x16xf32>
    %c15 = arith.constant 15 : index
    %100 = memref.load %arg1[%c15] : memref<98xf32, #tpu.memory_space<smem>>
    %c2_61 = arith.constant 2 : index
    %c1_62 = arith.constant 1 : index
    %101 = vector.load %arg4[%c2_61, %c1_62] : memref<22x22xf32, #tpu.memory_space<vmem>>, vector<16x16xf32>
    %102 = vector.broadcast %100 : f32 to vector<16x16xf32>
    %103 = arith.mulf %102, %101 : vector<16x16xf32>
    %104 = arith.addf %99, %103 : vector<16x16xf32>
    %c16 = arith.constant 16 : index
    %105 = memref.load %arg1[%c16] : memref<98xf32, #tpu.memory_space<smem>>
    %c2_63 = arith.constant 2 : index
    %c2_64 = arith.constant 2 : index
    %106 = vector.load %arg4[%c2_63, %c2_64] : memref<22x22xf32, #tpu.memory_space<vmem>>, vector<16x16xf32>
    %107 = vector.broadcast %105 : f32 to vector<16x16xf32>
    %108 = arith.mulf %107, %106 : vector<16x16xf32>
    %109 = arith.addf %104, %108 : vector<16x16xf32>
    %c17 = arith.constant 17 : index
    %110 = memref.load %arg1[%c17] : memref<98xf32, #tpu.memory_space<smem>>
    %c2_65 = arith.constant 2 : index
    %c3_66 = arith.constant 3 : index
    %111 = vector.load %arg4[%c2_65, %c3_66] : memref<22x22xf32, #tpu.memory_space<vmem>>, vector<16x16xf32>
    %112 = vector.broadcast %110 : f32 to vector<16x16xf32>
    %113 = arith.mulf %112, %111 : vector<16x16xf32>
    %114 = arith.addf %109, %113 : vector<16x16xf32>
    %c18 = arith.constant 18 : index
    %115 = memref.load %arg1[%c18] : memref<98xf32, #tpu.memory_space<smem>>
    %c2_67 = arith.constant 2 : index
    %c4_68 = arith.constant 4 : index
    %116 = vector.load %arg4[%c2_67, %c4_68] : memref<22x22xf32, #tpu.memory_space<vmem>>, vector<16x16xf32>
    %117 = vector.broadcast %115 : f32 to vector<16x16xf32>
    %118 = arith.mulf %117, %116 : vector<16x16xf32>
    %119 = arith.addf %114, %118 : vector<16x16xf32>
    %c19 = arith.constant 19 : index
    %120 = memref.load %arg1[%c19] : memref<98xf32, #tpu.memory_space<smem>>
    %c2_69 = arith.constant 2 : index
    %c5_70 = arith.constant 5 : index
    %121 = vector.load %arg4[%c2_69, %c5_70] : memref<22x22xf32, #tpu.memory_space<vmem>>, vector<16x16xf32>
    %122 = vector.broadcast %120 : f32 to vector<16x16xf32>
    %123 = arith.mulf %122, %121 : vector<16x16xf32>
    %124 = arith.addf %119, %123 : vector<16x16xf32>
    %c20 = arith.constant 20 : index
    %125 = memref.load %arg1[%c20] : memref<98xf32, #tpu.memory_space<smem>>
    %c2_71 = arith.constant 2 : index
    %c6_72 = arith.constant 6 : index
    %126 = vector.load %arg4[%c2_71, %c6_72] : memref<22x22xf32, #tpu.memory_space<vmem>>, vector<16x16xf32>
    %127 = vector.broadcast %125 : f32 to vector<16x16xf32>
    %128 = arith.mulf %127, %126 : vector<16x16xf32>
    %129 = arith.addf %124, %128 : vector<16x16xf32>
    %c21 = arith.constant 21 : index
    %130 = memref.load %arg1[%c21] : memref<98xf32, #tpu.memory_space<smem>>
    %c3_73 = arith.constant 3 : index
    %c0_74 = arith.constant 0 : index
    %131 = vector.load %arg4[%c3_73, %c0_74] : memref<22x22xf32, #tpu.memory_space<vmem>>, vector<16x16xf32>
    %132 = vector.broadcast %130 : f32 to vector<16x16xf32>
    %133 = arith.mulf %132, %131 : vector<16x16xf32>
    %134 = arith.addf %129, %133 : vector<16x16xf32>
    %c22 = arith.constant 22 : index
    %135 = memref.load %arg1[%c22] : memref<98xf32, #tpu.memory_space<smem>>
    %c3_75 = arith.constant 3 : index
    %c1_76 = arith.constant 1 : index
    %136 = vector.load %arg4[%c3_75, %c1_76] : memref<22x22xf32, #tpu.memory_space<vmem>>, vector<16x16xf32>
    %137 = vector.broadcast %135 : f32 to vector<16x16xf32>
    %138 = arith.mulf %137, %136 : vector<16x16xf32>
    %139 = arith.addf %134, %138 : vector<16x16xf32>
    %c23 = arith.constant 23 : index
    %140 = memref.load %arg1[%c23] : memref<98xf32, #tpu.memory_space<smem>>
    %c3_77 = arith.constant 3 : index
    %c2_78 = arith.constant 2 : index
    %141 = vector.load %arg4[%c3_77, %c2_78] : memref<22x22xf32, #tpu.memory_space<vmem>>, vector<16x16xf32>
    %142 = vector.broadcast %140 : f32 to vector<16x16xf32>
    %143 = arith.mulf %142, %141 : vector<16x16xf32>
    %144 = arith.addf %139, %143 : vector<16x16xf32>
    %c24 = arith.constant 24 : index
    %145 = memref.load %arg1[%c24] : memref<98xf32, #tpu.memory_space<smem>>
    %c3_79 = arith.constant 3 : index
    %c3_80 = arith.constant 3 : index
    %146 = vector.load %arg4[%c3_79, %c3_80] : memref<22x22xf32, #tpu.memory_space<vmem>>, vector<16x16xf32>
    %147 = vector.broadcast %145 : f32 to vector<16x16xf32>
    %148 = arith.mulf %147, %146 : vector<16x16xf32>
    %149 = arith.addf %144, %148 : vector<16x16xf32>
    %c25 = arith.constant 25 : index
    %150 = memref.load %arg1[%c25] : memref<98xf32, #tpu.memory_space<smem>>
    %c3_81 = arith.constant 3 : index
    %c4_82 = arith.constant 4 : index
    %151 = vector.load %arg4[%c3_81, %c4_82] : memref<22x22xf32, #tpu.memory_space<vmem>>, vector<16x16xf32>
    %152 = vector.broadcast %150 : f32 to vector<16x16xf32>
    %153 = arith.mulf %152, %151 : vector<16x16xf32>
    %154 = arith.addf %149, %153 : vector<16x16xf32>
    %c26 = arith.constant 26 : index
    %155 = memref.load %arg1[%c26] : memref<98xf32, #tpu.memory_space<smem>>
    %c3_83 = arith.constant 3 : index
    %c5_84 = arith.constant 5 : index
    %156 = vector.load %arg4[%c3_83, %c5_84] : memref<22x22xf32, #tpu.memory_space<vmem>>, vector<16x16xf32>
    %157 = vector.broadcast %155 : f32 to vector<16x16xf32>
    %158 = arith.mulf %157, %156 : vector<16x16xf32>
    %159 = arith.addf %154, %158 : vector<16x16xf32>
    %c27 = arith.constant 27 : index
    %160 = memref.load %arg1[%c27] : memref<98xf32, #tpu.memory_space<smem>>
    %c3_85 = arith.constant 3 : index
    %c6_86 = arith.constant 6 : index
    %161 = vector.load %arg4[%c3_85, %c6_86] : memref<22x22xf32, #tpu.memory_space<vmem>>, vector<16x16xf32>
    %162 = vector.broadcast %160 : f32 to vector<16x16xf32>
    %163 = arith.mulf %162, %161 : vector<16x16xf32>
    %164 = arith.addf %159, %163 : vector<16x16xf32>
    %c28 = arith.constant 28 : index
    %165 = memref.load %arg1[%c28] : memref<98xf32, #tpu.memory_space<smem>>
    %c4_87 = arith.constant 4 : index
    %c0_88 = arith.constant 0 : index
    %166 = vector.load %arg4[%c4_87, %c0_88] : memref<22x22xf32, #tpu.memory_space<vmem>>, vector<16x16xf32>
    %167 = vector.broadcast %165 : f32 to vector<16x16xf32>
    %168 = arith.mulf %167, %166 : vector<16x16xf32>
    %169 = arith.addf %164, %168 : vector<16x16xf32>
    %c29 = arith.constant 29 : index
    %170 = memref.load %arg1[%c29] : memref<98xf32, #tpu.memory_space<smem>>
    %c4_89 = arith.constant 4 : index
    %c1_90 = arith.constant 1 : index
    %171 = vector.load %arg4[%c4_89, %c1_90] : memref<22x22xf32, #tpu.memory_space<vmem>>, vector<16x16xf32>
    %172 = vector.broadcast %170 : f32 to vector<16x16xf32>
    %173 = arith.mulf %172, %171 : vector<16x16xf32>
    %174 = arith.addf %169, %173 : vector<16x16xf32>
    %c30 = arith.constant 30 : index
    %175 = memref.load %arg1[%c30] : memref<98xf32, #tpu.memory_space<smem>>
    %c4_91 = arith.constant 4 : index
    %c2_92 = arith.constant 2 : index
    %176 = vector.load %arg4[%c4_91, %c2_92] : memref<22x22xf32, #tpu.memory_space<vmem>>, vector<16x16xf32>
    %177 = vector.broadcast %175 : f32 to vector<16x16xf32>
    %178 = arith.mulf %177, %176 : vector<16x16xf32>
    %179 = arith.addf %174, %178 : vector<16x16xf32>
    %c31 = arith.constant 31 : index
    %180 = memref.load %arg1[%c31] : memref<98xf32, #tpu.memory_space<smem>>
    %c4_93 = arith.constant 4 : index
    %c3_94 = arith.constant 3 : index
    %181 = vector.load %arg4[%c4_93, %c3_94] : memref<22x22xf32, #tpu.memory_space<vmem>>, vector<16x16xf32>
    %182 = vector.broadcast %180 : f32 to vector<16x16xf32>
    %183 = arith.mulf %182, %181 : vector<16x16xf32>
    %184 = arith.addf %179, %183 : vector<16x16xf32>
    %c32 = arith.constant 32 : index
    %185 = memref.load %arg1[%c32] : memref<98xf32, #tpu.memory_space<smem>>
    %c4_95 = arith.constant 4 : index
    %c4_96 = arith.constant 4 : index
    %186 = vector.load %arg4[%c4_95, %c4_96] : memref<22x22xf32, #tpu.memory_space<vmem>>, vector<16x16xf32>
    %187 = vector.broadcast %185 : f32 to vector<16x16xf32>
    %188 = arith.mulf %187, %186 : vector<16x16xf32>
    %189 = arith.addf %184, %188 : vector<16x16xf32>
    %c33 = arith.constant 33 : index
    %190 = memref.load %arg1[%c33] : memref<98xf32, #tpu.memory_space<smem>>
    %c4_97 = arith.constant 4 : index
    %c5_98 = arith.constant 5 : index
    %191 = vector.load %arg4[%c4_97, %c5_98] : memref<22x22xf32, #tpu.memory_space<vmem>>, vector<16x16xf32>
    %192 = vector.broadcast %190 : f32 to vector<16x16xf32>
    %193 = arith.mulf %192, %191 : vector<16x16xf32>
    %194 = arith.addf %189, %193 : vector<16x16xf32>
    %c34 = arith.constant 34 : index
    %195 = memref.load %arg1[%c34] : memref<98xf32, #tpu.memory_space<smem>>
    %c4_99 = arith.constant 4 : index
    %c6_100 = arith.constant 6 : index
    %196 = vector.load %arg4[%c4_99, %c6_100] : memref<22x22xf32, #tpu.memory_space<vmem>>, vector<16x16xf32>
    %197 = vector.broadcast %195 : f32 to vector<16x16xf32>
    %198 = arith.mulf %197, %196 : vector<16x16xf32>
    %199 = arith.addf %194, %198 : vector<16x16xf32>
    %c35 = arith.constant 35 : index
    %200 = memref.load %arg1[%c35] : memref<98xf32, #tpu.memory_space<smem>>
    %c5_101 = arith.constant 5 : index
    %c0_102 = arith.constant 0 : index
    %201 = vector.load %arg4[%c5_101, %c0_102] : memref<22x22xf32, #tpu.memory_space<vmem>>, vector<16x16xf32>
    %202 = vector.broadcast %200 : f32 to vector<16x16xf32>
    %203 = arith.mulf %202, %201 : vector<16x16xf32>
    %204 = arith.addf %199, %203 : vector<16x16xf32>
    %c36 = arith.constant 36 : index
    %205 = memref.load %arg1[%c36] : memref<98xf32, #tpu.memory_space<smem>>
    %c5_103 = arith.constant 5 : index
    %c1_104 = arith.constant 1 : index
    %206 = vector.load %arg4[%c5_103, %c1_104] : memref<22x22xf32, #tpu.memory_space<vmem>>, vector<16x16xf32>
    %207 = vector.broadcast %205 : f32 to vector<16x16xf32>
    %208 = arith.mulf %207, %206 : vector<16x16xf32>
    %209 = arith.addf %204, %208 : vector<16x16xf32>
    %c37 = arith.constant 37 : index
    %210 = memref.load %arg1[%c37] : memref<98xf32, #tpu.memory_space<smem>>
    %c5_105 = arith.constant 5 : index
    %c2_106 = arith.constant 2 : index
    %211 = vector.load %arg4[%c5_105, %c2_106] : memref<22x22xf32, #tpu.memory_space<vmem>>, vector<16x16xf32>
    %212 = vector.broadcast %210 : f32 to vector<16x16xf32>
    %213 = arith.mulf %212, %211 : vector<16x16xf32>
    %214 = arith.addf %209, %213 : vector<16x16xf32>
    %c38 = arith.constant 38 : index
    %215 = memref.load %arg1[%c38] : memref<98xf32, #tpu.memory_space<smem>>
    %c5_107 = arith.constant 5 : index
    %c3_108 = arith.constant 3 : index
    %216 = vector.load %arg4[%c5_107, %c3_108] : memref<22x22xf32, #tpu.memory_space<vmem>>, vector<16x16xf32>
    %217 = vector.broadcast %215 : f32 to vector<16x16xf32>
    %218 = arith.mulf %217, %216 : vector<16x16xf32>
    %219 = arith.addf %214, %218 : vector<16x16xf32>
    %c39 = arith.constant 39 : index
    %220 = memref.load %arg1[%c39] : memref<98xf32, #tpu.memory_space<smem>>
    %c5_109 = arith.constant 5 : index
    %c4_110 = arith.constant 4 : index
    %221 = vector.load %arg4[%c5_109, %c4_110] : memref<22x22xf32, #tpu.memory_space<vmem>>, vector<16x16xf32>
    %222 = vector.broadcast %220 : f32 to vector<16x16xf32>
    %223 = arith.mulf %222, %221 : vector<16x16xf32>
    %224 = arith.addf %219, %223 : vector<16x16xf32>
    %c40 = arith.constant 40 : index
    %225 = memref.load %arg1[%c40] : memref<98xf32, #tpu.memory_space<smem>>
    %c5_111 = arith.constant 5 : index
    %c5_112 = arith.constant 5 : index
    %226 = vector.load %arg4[%c5_111, %c5_112] : memref<22x22xf32, #tpu.memory_space<vmem>>, vector<16x16xf32>
    %227 = vector.broadcast %225 : f32 to vector<16x16xf32>
    %228 = arith.mulf %227, %226 : vector<16x16xf32>
    %229 = arith.addf %224, %228 : vector<16x16xf32>
    %c41 = arith.constant 41 : index
    %230 = memref.load %arg1[%c41] : memref<98xf32, #tpu.memory_space<smem>>
    %c5_113 = arith.constant 5 : index
    %c6_114 = arith.constant 6 : index
    %231 = vector.load %arg4[%c5_113, %c6_114] : memref<22x22xf32, #tpu.memory_space<vmem>>, vector<16x16xf32>
    %232 = vector.broadcast %230 : f32 to vector<16x16xf32>
    %233 = arith.mulf %232, %231 : vector<16x16xf32>
    %234 = arith.addf %229, %233 : vector<16x16xf32>
    %c42 = arith.constant 42 : index
    %235 = memref.load %arg1[%c42] : memref<98xf32, #tpu.memory_space<smem>>
    %c6_115 = arith.constant 6 : index
    %c0_116 = arith.constant 0 : index
    %236 = vector.load %arg4[%c6_115, %c0_116] : memref<22x22xf32, #tpu.memory_space<vmem>>, vector<16x16xf32>
    %237 = vector.broadcast %235 : f32 to vector<16x16xf32>
    %238 = arith.mulf %237, %236 : vector<16x16xf32>
    %239 = arith.addf %234, %238 : vector<16x16xf32>
    %c43 = arith.constant 43 : index
    %240 = memref.load %arg1[%c43] : memref<98xf32, #tpu.memory_space<smem>>
    %c6_117 = arith.constant 6 : index
    %c1_118 = arith.constant 1 : index
    %241 = vector.load %arg4[%c6_117, %c1_118] : memref<22x22xf32, #tpu.memory_space<vmem>>, vector<16x16xf32>
    %242 = vector.broadcast %240 : f32 to vector<16x16xf32>
    %243 = arith.mulf %242, %241 : vector<16x16xf32>
    %244 = arith.addf %239, %243 : vector<16x16xf32>
    %c44 = arith.constant 44 : index
    %245 = memref.load %arg1[%c44] : memref<98xf32, #tpu.memory_space<smem>>
    %c6_119 = arith.constant 6 : index
    %c2_120 = arith.constant 2 : index
    %246 = vector.load %arg4[%c6_119, %c2_120] : memref<22x22xf32, #tpu.memory_space<vmem>>, vector<16x16xf32>
    %247 = vector.broadcast %245 : f32 to vector<16x16xf32>
    %248 = arith.mulf %247, %246 : vector<16x16xf32>
    %249 = arith.addf %244, %248 : vector<16x16xf32>
    %c45 = arith.constant 45 : index
    %250 = memref.load %arg1[%c45] : memref<98xf32, #tpu.memory_space<smem>>
    %c6_121 = arith.constant 6 : index
    %c3_122 = arith.constant 3 : index
    %251 = vector.load %arg4[%c6_121, %c3_122] : memref<22x22xf32, #tpu.memory_space<vmem>>, vector<16x16xf32>
    %252 = vector.broadcast %250 : f32 to vector<16x16xf32>
    %253 = arith.mulf %252, %251 : vector<16x16xf32>
    %254 = arith.addf %249, %253 : vector<16x16xf32>
    %c46 = arith.constant 46 : index
    %255 = memref.load %arg1[%c46] : memref<98xf32, #tpu.memory_space<smem>>
    %c6_123 = arith.constant 6 : index
    %c4_124 = arith.constant 4 : index
    %256 = vector.load %arg4[%c6_123, %c4_124] : memref<22x22xf32, #tpu.memory_space<vmem>>, vector<16x16xf32>
    %257 = vector.broadcast %255 : f32 to vector<16x16xf32>
    %258 = arith.mulf %257, %256 : vector<16x16xf32>
    %259 = arith.addf %254, %258 : vector<16x16xf32>
    %c47 = arith.constant 47 : index
    %260 = memref.load %arg1[%c47] : memref<98xf32, #tpu.memory_space<smem>>
    %c6_125 = arith.constant 6 : index
    %c5_126 = arith.constant 5 : index
    %261 = vector.load %arg4[%c6_125, %c5_126] : memref<22x22xf32, #tpu.memory_space<vmem>>, vector<16x16xf32>
    %262 = vector.broadcast %260 : f32 to vector<16x16xf32>
    %263 = arith.mulf %262, %261 : vector<16x16xf32>
    %264 = arith.addf %259, %263 : vector<16x16xf32>
    %c48 = arith.constant 48 : index
    %265 = memref.load %arg1[%c48] : memref<98xf32, #tpu.memory_space<smem>>
    %c6_127 = arith.constant 6 : index
    %c6_128 = arith.constant 6 : index
    %266 = vector.load %arg4[%c6_127, %c6_128] : memref<22x22xf32, #tpu.memory_space<vmem>>, vector<16x16xf32>
    %267 = vector.broadcast %265 : f32 to vector<16x16xf32>
    %268 = arith.mulf %267, %266 : vector<16x16xf32>
    %269 = arith.addf %264, %268 : vector<16x16xf32>
    %c49 = arith.constant 49 : index
    %270 = memref.load %arg1[%c49] : memref<98xf32, #tpu.memory_space<smem>>
    %c0_129 = arith.constant 0 : index
    %c0_130 = arith.constant 0 : index
    %271 = vector.load %arg5[%c0_129, %c0_130] : memref<22x22xf32, #tpu.memory_space<vmem>>, vector<16x16xf32>
    %272 = vector.broadcast %270 : f32 to vector<16x16xf32>
    %273 = arith.mulf %272, %271 : vector<16x16xf32>
    %274 = arith.addf %269, %273 : vector<16x16xf32>
    %c50 = arith.constant 50 : index
    %275 = memref.load %arg1[%c50] : memref<98xf32, #tpu.memory_space<smem>>
    %c0_131 = arith.constant 0 : index
    %c1_132 = arith.constant 1 : index
    %276 = vector.load %arg5[%c0_131, %c1_132] : memref<22x22xf32, #tpu.memory_space<vmem>>, vector<16x16xf32>
    %277 = vector.broadcast %275 : f32 to vector<16x16xf32>
    %278 = arith.mulf %277, %276 : vector<16x16xf32>
    %279 = arith.addf %274, %278 : vector<16x16xf32>
    %c51 = arith.constant 51 : index
    %280 = memref.load %arg1[%c51] : memref<98xf32, #tpu.memory_space<smem>>
    %c0_133 = arith.constant 0 : index
    %c2_134 = arith.constant 2 : index
    %281 = vector.load %arg5[%c0_133, %c2_134] : memref<22x22xf32, #tpu.memory_space<vmem>>, vector<16x16xf32>
    %282 = vector.broadcast %280 : f32 to vector<16x16xf32>
    %283 = arith.mulf %282, %281 : vector<16x16xf32>
    %284 = arith.addf %279, %283 : vector<16x16xf32>
    %c52 = arith.constant 52 : index
    %285 = memref.load %arg1[%c52] : memref<98xf32, #tpu.memory_space<smem>>
    %c0_135 = arith.constant 0 : index
    %c3_136 = arith.constant 3 : index
    %286 = vector.load %arg5[%c0_135, %c3_136] : memref<22x22xf32, #tpu.memory_space<vmem>>, vector<16x16xf32>
    %287 = vector.broadcast %285 : f32 to vector<16x16xf32>
    %288 = arith.mulf %287, %286 : vector<16x16xf32>
    %289 = arith.addf %284, %288 : vector<16x16xf32>
    %c53 = arith.constant 53 : index
    %290 = memref.load %arg1[%c53] : memref<98xf32, #tpu.memory_space<smem>>
    %c0_137 = arith.constant 0 : index
    %c4_138 = arith.constant 4 : index
    %291 = vector.load %arg5[%c0_137, %c4_138] : memref<22x22xf32, #tpu.memory_space<vmem>>, vector<16x16xf32>
    %292 = vector.broadcast %290 : f32 to vector<16x16xf32>
    %293 = arith.mulf %292, %291 : vector<16x16xf32>
    %294 = arith.addf %289, %293 : vector<16x16xf32>
    %c54 = arith.constant 54 : index
    %295 = memref.load %arg1[%c54] : memref<98xf32, #tpu.memory_space<smem>>
    %c0_139 = arith.constant 0 : index
    %c5_140 = arith.constant 5 : index
    %296 = vector.load %arg5[%c0_139, %c5_140] : memref<22x22xf32, #tpu.memory_space<vmem>>, vector<16x16xf32>
    %297 = vector.broadcast %295 : f32 to vector<16x16xf32>
    %298 = arith.mulf %297, %296 : vector<16x16xf32>
    %299 = arith.addf %294, %298 : vector<16x16xf32>
    %c55 = arith.constant 55 : index
    %300 = memref.load %arg1[%c55] : memref<98xf32, #tpu.memory_space<smem>>
    %c0_141 = arith.constant 0 : index
    %c6_142 = arith.constant 6 : index
    %301 = vector.load %arg5[%c0_141, %c6_142] : memref<22x22xf32, #tpu.memory_space<vmem>>, vector<16x16xf32>
    %302 = vector.broadcast %300 : f32 to vector<16x16xf32>
    %303 = arith.mulf %302, %301 : vector<16x16xf32>
    %304 = arith.addf %299, %303 : vector<16x16xf32>
    %c56 = arith.constant 56 : index
    %305 = memref.load %arg1[%c56] : memref<98xf32, #tpu.memory_space<smem>>
    %c1_143 = arith.constant 1 : index
    %c0_144 = arith.constant 0 : index
    %306 = vector.load %arg5[%c1_143, %c0_144] : memref<22x22xf32, #tpu.memory_space<vmem>>, vector<16x16xf32>
    %307 = vector.broadcast %305 : f32 to vector<16x16xf32>
    %308 = arith.mulf %307, %306 : vector<16x16xf32>
    %309 = arith.addf %304, %308 : vector<16x16xf32>
    %c57 = arith.constant 57 : index
    %310 = memref.load %arg1[%c57] : memref<98xf32, #tpu.memory_space<smem>>
    %c1_145 = arith.constant 1 : index
    %c1_146 = arith.constant 1 : index
    %311 = vector.load %arg5[%c1_145, %c1_146] : memref<22x22xf32, #tpu.memory_space<vmem>>, vector<16x16xf32>
    %312 = vector.broadcast %310 : f32 to vector<16x16xf32>
    %313 = arith.mulf %312, %311 : vector<16x16xf32>
    %314 = arith.addf %309, %313 : vector<16x16xf32>
    %c58 = arith.constant 58 : index
    %315 = memref.load %arg1[%c58] : memref<98xf32, #tpu.memory_space<smem>>
    %c1_147 = arith.constant 1 : index
    %c2_148 = arith.constant 2 : index
    %316 = vector.load %arg5[%c1_147, %c2_148] : memref<22x22xf32, #tpu.memory_space<vmem>>, vector<16x16xf32>
    %317 = vector.broadcast %315 : f32 to vector<16x16xf32>
    %318 = arith.mulf %317, %316 : vector<16x16xf32>
    %319 = arith.addf %314, %318 : vector<16x16xf32>
    %c59 = arith.constant 59 : index
    %320 = memref.load %arg1[%c59] : memref<98xf32, #tpu.memory_space<smem>>
    %c1_149 = arith.constant 1 : index
    %c3_150 = arith.constant 3 : index
    %321 = vector.load %arg5[%c1_149, %c3_150] : memref<22x22xf32, #tpu.memory_space<vmem>>, vector<16x16xf32>
    %322 = vector.broadcast %320 : f32 to vector<16x16xf32>
    %323 = arith.mulf %322, %321 : vector<16x16xf32>
    %324 = arith.addf %319, %323 : vector<16x16xf32>
    %c60 = arith.constant 60 : index
    %325 = memref.load %arg1[%c60] : memref<98xf32, #tpu.memory_space<smem>>
    %c1_151 = arith.constant 1 : index
    %c4_152 = arith.constant 4 : index
    %326 = vector.load %arg5[%c1_151, %c4_152] : memref<22x22xf32, #tpu.memory_space<vmem>>, vector<16x16xf32>
    %327 = vector.broadcast %325 : f32 to vector<16x16xf32>
    %328 = arith.mulf %327, %326 : vector<16x16xf32>
    %329 = arith.addf %324, %328 : vector<16x16xf32>
    %c61 = arith.constant 61 : index
    %330 = memref.load %arg1[%c61] : memref<98xf32, #tpu.memory_space<smem>>
    %c1_153 = arith.constant 1 : index
    %c5_154 = arith.constant 5 : index
    %331 = vector.load %arg5[%c1_153, %c5_154] : memref<22x22xf32, #tpu.memory_space<vmem>>, vector<16x16xf32>
    %332 = vector.broadcast %330 : f32 to vector<16x16xf32>
    %333 = arith.mulf %332, %331 : vector<16x16xf32>
    %334 = arith.addf %329, %333 : vector<16x16xf32>
    %c62 = arith.constant 62 : index
    %335 = memref.load %arg1[%c62] : memref<98xf32, #tpu.memory_space<smem>>
    %c1_155 = arith.constant 1 : index
    %c6_156 = arith.constant 6 : index
    %336 = vector.load %arg5[%c1_155, %c6_156] : memref<22x22xf32, #tpu.memory_space<vmem>>, vector<16x16xf32>
    %337 = vector.broadcast %335 : f32 to vector<16x16xf32>
    %338 = arith.mulf %337, %336 : vector<16x16xf32>
    %339 = arith.addf %334, %338 : vector<16x16xf32>
    %c63 = arith.constant 63 : index
    %340 = memref.load %arg1[%c63] : memref<98xf32, #tpu.memory_space<smem>>
    %c2_157 = arith.constant 2 : index
    %c0_158 = arith.constant 0 : index
    %341 = vector.load %arg5[%c2_157, %c0_158] : memref<22x22xf32, #tpu.memory_space<vmem>>, vector<16x16xf32>
    %342 = vector.broadcast %340 : f32 to vector<16x16xf32>
    %343 = arith.mulf %342, %341 : vector<16x16xf32>
    %344 = arith.addf %339, %343 : vector<16x16xf32>
    %c64 = arith.constant 64 : index
    %345 = memref.load %arg1[%c64] : memref<98xf32, #tpu.memory_space<smem>>
    %c2_159 = arith.constant 2 : index
    %c1_160 = arith.constant 1 : index
    %346 = vector.load %arg5[%c2_159, %c1_160] : memref<22x22xf32, #tpu.memory_space<vmem>>, vector<16x16xf32>
    %347 = vector.broadcast %345 : f32 to vector<16x16xf32>
    %348 = arith.mulf %347, %346 : vector<16x16xf32>
    %349 = arith.addf %344, %348 : vector<16x16xf32>
    %c65 = arith.constant 65 : index
    %350 = memref.load %arg1[%c65] : memref<98xf32, #tpu.memory_space<smem>>
    %c2_161 = arith.constant 2 : index
    %c2_162 = arith.constant 2 : index
    %351 = vector.load %arg5[%c2_161, %c2_162] : memref<22x22xf32, #tpu.memory_space<vmem>>, vector<16x16xf32>
    %352 = vector.broadcast %350 : f32 to vector<16x16xf32>
    %353 = arith.mulf %352, %351 : vector<16x16xf32>
    %354 = arith.addf %349, %353 : vector<16x16xf32>
    %c66 = arith.constant 66 : index
    %355 = memref.load %arg1[%c66] : memref<98xf32, #tpu.memory_space<smem>>
    %c2_163 = arith.constant 2 : index
    %c3_164 = arith.constant 3 : index
    %356 = vector.load %arg5[%c2_163, %c3_164] : memref<22x22xf32, #tpu.memory_space<vmem>>, vector<16x16xf32>
    %357 = vector.broadcast %355 : f32 to vector<16x16xf32>
    %358 = arith.mulf %357, %356 : vector<16x16xf32>
    %359 = arith.addf %354, %358 : vector<16x16xf32>
    %c67 = arith.constant 67 : index
    %360 = memref.load %arg1[%c67] : memref<98xf32, #tpu.memory_space<smem>>
    %c2_165 = arith.constant 2 : index
    %c4_166 = arith.constant 4 : index
    %361 = vector.load %arg5[%c2_165, %c4_166] : memref<22x22xf32, #tpu.memory_space<vmem>>, vector<16x16xf32>
    %362 = vector.broadcast %360 : f32 to vector<16x16xf32>
    %363 = arith.mulf %362, %361 : vector<16x16xf32>
    %364 = arith.addf %359, %363 : vector<16x16xf32>
    %c68 = arith.constant 68 : index
    %365 = memref.load %arg1[%c68] : memref<98xf32, #tpu.memory_space<smem>>
    %c2_167 = arith.constant 2 : index
    %c5_168 = arith.constant 5 : index
    %366 = vector.load %arg5[%c2_167, %c5_168] : memref<22x22xf32, #tpu.memory_space<vmem>>, vector<16x16xf32>
    %367 = vector.broadcast %365 : f32 to vector<16x16xf32>
    %368 = arith.mulf %367, %366 : vector<16x16xf32>
    %369 = arith.addf %364, %368 : vector<16x16xf32>
    %c69 = arith.constant 69 : index
    %370 = memref.load %arg1[%c69] : memref<98xf32, #tpu.memory_space<smem>>
    %c2_169 = arith.constant 2 : index
    %c6_170 = arith.constant 6 : index
    %371 = vector.load %arg5[%c2_169, %c6_170] : memref<22x22xf32, #tpu.memory_space<vmem>>, vector<16x16xf32>
    %372 = vector.broadcast %370 : f32 to vector<16x16xf32>
    %373 = arith.mulf %372, %371 : vector<16x16xf32>
    %374 = arith.addf %369, %373 : vector<16x16xf32>
    %c70 = arith.constant 70 : index
    %375 = memref.load %arg1[%c70] : memref<98xf32, #tpu.memory_space<smem>>
    %c3_171 = arith.constant 3 : index
    %c0_172 = arith.constant 0 : index
    %376 = vector.load %arg5[%c3_171, %c0_172] : memref<22x22xf32, #tpu.memory_space<vmem>>, vector<16x16xf32>
    %377 = vector.broadcast %375 : f32 to vector<16x16xf32>
    %378 = arith.mulf %377, %376 : vector<16x16xf32>
    %379 = arith.addf %374, %378 : vector<16x16xf32>
    %c71 = arith.constant 71 : index
    %380 = memref.load %arg1[%c71] : memref<98xf32, #tpu.memory_space<smem>>
    %c3_173 = arith.constant 3 : index
    %c1_174 = arith.constant 1 : index
    %381 = vector.load %arg5[%c3_173, %c1_174] : memref<22x22xf32, #tpu.memory_space<vmem>>, vector<16x16xf32>
    %382 = vector.broadcast %380 : f32 to vector<16x16xf32>
    %383 = arith.mulf %382, %381 : vector<16x16xf32>
    %384 = arith.addf %379, %383 : vector<16x16xf32>
    %c72 = arith.constant 72 : index
    %385 = memref.load %arg1[%c72] : memref<98xf32, #tpu.memory_space<smem>>
    %c3_175 = arith.constant 3 : index
    %c2_176 = arith.constant 2 : index
    %386 = vector.load %arg5[%c3_175, %c2_176] : memref<22x22xf32, #tpu.memory_space<vmem>>, vector<16x16xf32>
    %387 = vector.broadcast %385 : f32 to vector<16x16xf32>
    %388 = arith.mulf %387, %386 : vector<16x16xf32>
    %389 = arith.addf %384, %388 : vector<16x16xf32>
    %c73 = arith.constant 73 : index
    %390 = memref.load %arg1[%c73] : memref<98xf32, #tpu.memory_space<smem>>
    %c3_177 = arith.constant 3 : index
    %c3_178 = arith.constant 3 : index
    %391 = vector.load %arg5[%c3_177, %c3_178] : memref<22x22xf32, #tpu.memory_space<vmem>>, vector<16x16xf32>
    %392 = vector.broadcast %390 : f32 to vector<16x16xf32>
    %393 = arith.mulf %392, %391 : vector<16x16xf32>
    %394 = arith.addf %389, %393 : vector<16x16xf32>
    %c74 = arith.constant 74 : index
    %395 = memref.load %arg1[%c74] : memref<98xf32, #tpu.memory_space<smem>>
    %c3_179 = arith.constant 3 : index
    %c4_180 = arith.constant 4 : index
    %396 = vector.load %arg5[%c3_179, %c4_180] : memref<22x22xf32, #tpu.memory_space<vmem>>, vector<16x16xf32>
    %397 = vector.broadcast %395 : f32 to vector<16x16xf32>
    %398 = arith.mulf %397, %396 : vector<16x16xf32>
    %399 = arith.addf %394, %398 : vector<16x16xf32>
    %c75 = arith.constant 75 : index
    %400 = memref.load %arg1[%c75] : memref<98xf32, #tpu.memory_space<smem>>
    %c3_181 = arith.constant 3 : index
    %c5_182 = arith.constant 5 : index
    %401 = vector.load %arg5[%c3_181, %c5_182] : memref<22x22xf32, #tpu.memory_space<vmem>>, vector<16x16xf32>
    %402 = vector.broadcast %400 : f32 to vector<16x16xf32>
    %403 = arith.mulf %402, %401 : vector<16x16xf32>
    %404 = arith.addf %399, %403 : vector<16x16xf32>
    %c76 = arith.constant 76 : index
    %405 = memref.load %arg1[%c76] : memref<98xf32, #tpu.memory_space<smem>>
    %c3_183 = arith.constant 3 : index
    %c6_184 = arith.constant 6 : index
    %406 = vector.load %arg5[%c3_183, %c6_184] : memref<22x22xf32, #tpu.memory_space<vmem>>, vector<16x16xf32>
    %407 = vector.broadcast %405 : f32 to vector<16x16xf32>
    %408 = arith.mulf %407, %406 : vector<16x16xf32>
    %409 = arith.addf %404, %408 : vector<16x16xf32>
    %c77 = arith.constant 77 : index
    %410 = memref.load %arg1[%c77] : memref<98xf32, #tpu.memory_space<smem>>
    %c4_185 = arith.constant 4 : index
    %c0_186 = arith.constant 0 : index
    %411 = vector.load %arg5[%c4_185, %c0_186] : memref<22x22xf32, #tpu.memory_space<vmem>>, vector<16x16xf32>
    %412 = vector.broadcast %410 : f32 to vector<16x16xf32>
    %413 = arith.mulf %412, %411 : vector<16x16xf32>
    %414 = arith.addf %409, %413 : vector<16x16xf32>
    %c78 = arith.constant 78 : index
    %415 = memref.load %arg1[%c78] : memref<98xf32, #tpu.memory_space<smem>>
    %c4_187 = arith.constant 4 : index
    %c1_188 = arith.constant 1 : index
    %416 = vector.load %arg5[%c4_187, %c1_188] : memref<22x22xf32, #tpu.memory_space<vmem>>, vector<16x16xf32>
    %417 = vector.broadcast %415 : f32 to vector<16x16xf32>
    %418 = arith.mulf %417, %416 : vector<16x16xf32>
    %419 = arith.addf %414, %418 : vector<16x16xf32>
    %c79 = arith.constant 79 : index
    %420 = memref.load %arg1[%c79] : memref<98xf32, #tpu.memory_space<smem>>
    %c4_189 = arith.constant 4 : index
    %c2_190 = arith.constant 2 : index
    %421 = vector.load %arg5[%c4_189, %c2_190] : memref<22x22xf32, #tpu.memory_space<vmem>>, vector<16x16xf32>
    %422 = vector.broadcast %420 : f32 to vector<16x16xf32>
    %423 = arith.mulf %422, %421 : vector<16x16xf32>
    %424 = arith.addf %419, %423 : vector<16x16xf32>
    %c80 = arith.constant 80 : index
    %425 = memref.load %arg1[%c80] : memref<98xf32, #tpu.memory_space<smem>>
    %c4_191 = arith.constant 4 : index
    %c3_192 = arith.constant 3 : index
    %426 = vector.load %arg5[%c4_191, %c3_192] : memref<22x22xf32, #tpu.memory_space<vmem>>, vector<16x16xf32>
    %427 = vector.broadcast %425 : f32 to vector<16x16xf32>
    %428 = arith.mulf %427, %426 : vector<16x16xf32>
    %429 = arith.addf %424, %428 : vector<16x16xf32>
    %c81 = arith.constant 81 : index
    %430 = memref.load %arg1[%c81] : memref<98xf32, #tpu.memory_space<smem>>
    %c4_193 = arith.constant 4 : index
    %c4_194 = arith.constant 4 : index
    %431 = vector.load %arg5[%c4_193, %c4_194] : memref<22x22xf32, #tpu.memory_space<vmem>>, vector<16x16xf32>
    %432 = vector.broadcast %430 : f32 to vector<16x16xf32>
    %433 = arith.mulf %432, %431 : vector<16x16xf32>
    %434 = arith.addf %429, %433 : vector<16x16xf32>
    %c82 = arith.constant 82 : index
    %435 = memref.load %arg1[%c82] : memref<98xf32, #tpu.memory_space<smem>>
    %c4_195 = arith.constant 4 : index
    %c5_196 = arith.constant 5 : index
    %436 = vector.load %arg5[%c4_195, %c5_196] : memref<22x22xf32, #tpu.memory_space<vmem>>, vector<16x16xf32>
    %437 = vector.broadcast %435 : f32 to vector<16x16xf32>
    %438 = arith.mulf %437, %436 : vector<16x16xf32>
    %439 = arith.addf %434, %438 : vector<16x16xf32>
    %c83 = arith.constant 83 : index
    %440 = memref.load %arg1[%c83] : memref<98xf32, #tpu.memory_space<smem>>
    %c4_197 = arith.constant 4 : index
    %c6_198 = arith.constant 6 : index
    %441 = vector.load %arg5[%c4_197, %c6_198] : memref<22x22xf32, #tpu.memory_space<vmem>>, vector<16x16xf32>
    %442 = vector.broadcast %440 : f32 to vector<16x16xf32>
    %443 = arith.mulf %442, %441 : vector<16x16xf32>
    %444 = arith.addf %439, %443 : vector<16x16xf32>
    %c84 = arith.constant 84 : index
    %445 = memref.load %arg1[%c84] : memref<98xf32, #tpu.memory_space<smem>>
    %c5_199 = arith.constant 5 : index
    %c0_200 = arith.constant 0 : index
    %446 = vector.load %arg5[%c5_199, %c0_200] : memref<22x22xf32, #tpu.memory_space<vmem>>, vector<16x16xf32>
    %447 = vector.broadcast %445 : f32 to vector<16x16xf32>
    %448 = arith.mulf %447, %446 : vector<16x16xf32>
    %449 = arith.addf %444, %448 : vector<16x16xf32>
    %c85 = arith.constant 85 : index
    %450 = memref.load %arg1[%c85] : memref<98xf32, #tpu.memory_space<smem>>
    %c5_201 = arith.constant 5 : index
    %c1_202 = arith.constant 1 : index
    %451 = vector.load %arg5[%c5_201, %c1_202] : memref<22x22xf32, #tpu.memory_space<vmem>>, vector<16x16xf32>
    %452 = vector.broadcast %450 : f32 to vector<16x16xf32>
    %453 = arith.mulf %452, %451 : vector<16x16xf32>
    %454 = arith.addf %449, %453 : vector<16x16xf32>
    %c86 = arith.constant 86 : index
    %455 = memref.load %arg1[%c86] : memref<98xf32, #tpu.memory_space<smem>>
    %c5_203 = arith.constant 5 : index
    %c2_204 = arith.constant 2 : index
    %456 = vector.load %arg5[%c5_203, %c2_204] : memref<22x22xf32, #tpu.memory_space<vmem>>, vector<16x16xf32>
    %457 = vector.broadcast %455 : f32 to vector<16x16xf32>
    %458 = arith.mulf %457, %456 : vector<16x16xf32>
    %459 = arith.addf %454, %458 : vector<16x16xf32>
    %c87 = arith.constant 87 : index
    %460 = memref.load %arg1[%c87] : memref<98xf32, #tpu.memory_space<smem>>
    %c5_205 = arith.constant 5 : index
    %c3_206 = arith.constant 3 : index
    %461 = vector.load %arg5[%c5_205, %c3_206] : memref<22x22xf32, #tpu.memory_space<vmem>>, vector<16x16xf32>
    %462 = vector.broadcast %460 : f32 to vector<16x16xf32>
    %463 = arith.mulf %462, %461 : vector<16x16xf32>
    %464 = arith.addf %459, %463 : vector<16x16xf32>
    %c88 = arith.constant 88 : index
    %465 = memref.load %arg1[%c88] : memref<98xf32, #tpu.memory_space<smem>>
    %c5_207 = arith.constant 5 : index
    %c4_208 = arith.constant 4 : index
    %466 = vector.load %arg5[%c5_207, %c4_208] : memref<22x22xf32, #tpu.memory_space<vmem>>, vector<16x16xf32>
    %467 = vector.broadcast %465 : f32 to vector<16x16xf32>
    %468 = arith.mulf %467, %466 : vector<16x16xf32>
    %469 = arith.addf %464, %468 : vector<16x16xf32>
    %c89 = arith.constant 89 : index
    %470 = memref.load %arg1[%c89] : memref<98xf32, #tpu.memory_space<smem>>
    %c5_209 = arith.constant 5 : index
    %c5_210 = arith.constant 5 : index
    %471 = vector.load %arg5[%c5_209, %c5_210] : memref<22x22xf32, #tpu.memory_space<vmem>>, vector<16x16xf32>
    %472 = vector.broadcast %470 : f32 to vector<16x16xf32>
    %473 = arith.mulf %472, %471 : vector<16x16xf32>
    %474 = arith.addf %469, %473 : vector<16x16xf32>
    %c90 = arith.constant 90 : index
    %475 = memref.load %arg1[%c90] : memref<98xf32, #tpu.memory_space<smem>>
    %c5_211 = arith.constant 5 : index
    %c6_212 = arith.constant 6 : index
    %476 = vector.load %arg5[%c5_211, %c6_212] : memref<22x22xf32, #tpu.memory_space<vmem>>, vector<16x16xf32>
    %477 = vector.broadcast %475 : f32 to vector<16x16xf32>
    %478 = arith.mulf %477, %476 : vector<16x16xf32>
    %479 = arith.addf %474, %478 : vector<16x16xf32>
    %c91 = arith.constant 91 : index
    %480 = memref.load %arg1[%c91] : memref<98xf32, #tpu.memory_space<smem>>
    %c6_213 = arith.constant 6 : index
    %c0_214 = arith.constant 0 : index
    %481 = vector.load %arg5[%c6_213, %c0_214] : memref<22x22xf32, #tpu.memory_space<vmem>>, vector<16x16xf32>
    %482 = vector.broadcast %480 : f32 to vector<16x16xf32>
    %483 = arith.mulf %482, %481 : vector<16x16xf32>
    %484 = arith.addf %479, %483 : vector<16x16xf32>
    %c92 = arith.constant 92 : index
    %485 = memref.load %arg1[%c92] : memref<98xf32, #tpu.memory_space<smem>>
    %c6_215 = arith.constant 6 : index
    %c1_216 = arith.constant 1 : index
    %486 = vector.load %arg5[%c6_215, %c1_216] : memref<22x22xf32, #tpu.memory_space<vmem>>, vector<16x16xf32>
    %487 = vector.broadcast %485 : f32 to vector<16x16xf32>
    %488 = arith.mulf %487, %486 : vector<16x16xf32>
    %489 = arith.addf %484, %488 : vector<16x16xf32>
    %c93 = arith.constant 93 : index
    %490 = memref.load %arg1[%c93] : memref<98xf32, #tpu.memory_space<smem>>
    %c6_217 = arith.constant 6 : index
    %c2_218 = arith.constant 2 : index
    %491 = vector.load %arg5[%c6_217, %c2_218] : memref<22x22xf32, #tpu.memory_space<vmem>>, vector<16x16xf32>
    %492 = vector.broadcast %490 : f32 to vector<16x16xf32>
    %493 = arith.mulf %492, %491 : vector<16x16xf32>
    %494 = arith.addf %489, %493 : vector<16x16xf32>
    %c94 = arith.constant 94 : index
    %495 = memref.load %arg1[%c94] : memref<98xf32, #tpu.memory_space<smem>>
    %c6_219 = arith.constant 6 : index
    %c3_220 = arith.constant 3 : index
    %496 = vector.load %arg5[%c6_219, %c3_220] : memref<22x22xf32, #tpu.memory_space<vmem>>, vector<16x16xf32>
    %497 = vector.broadcast %495 : f32 to vector<16x16xf32>
    %498 = arith.mulf %497, %496 : vector<16x16xf32>
    %499 = arith.addf %494, %498 : vector<16x16xf32>
    %c95 = arith.constant 95 : index
    %500 = memref.load %arg1[%c95] : memref<98xf32, #tpu.memory_space<smem>>
    %c6_221 = arith.constant 6 : index
    %c4_222 = arith.constant 4 : index
    %501 = vector.load %arg5[%c6_221, %c4_222] : memref<22x22xf32, #tpu.memory_space<vmem>>, vector<16x16xf32>
    %502 = vector.broadcast %500 : f32 to vector<16x16xf32>
    %503 = arith.mulf %502, %501 : vector<16x16xf32>
    %504 = arith.addf %499, %503 : vector<16x16xf32>
    %c96 = arith.constant 96 : index
    %505 = memref.load %arg1[%c96] : memref<98xf32, #tpu.memory_space<smem>>
    %c6_223 = arith.constant 6 : index
    %c5_224 = arith.constant 5 : index
    %506 = vector.load %arg5[%c6_223, %c5_224] : memref<22x22xf32, #tpu.memory_space<vmem>>, vector<16x16xf32>
    %507 = vector.broadcast %505 : f32 to vector<16x16xf32>
    %508 = arith.mulf %507, %506 : vector<16x16xf32>
    %509 = arith.addf %504, %508 : vector<16x16xf32>
    %c97 = arith.constant 97 : index
    %510 = memref.load %arg1[%c97] : memref<98xf32, #tpu.memory_space<smem>>
    %c6_225 = arith.constant 6 : index
    %c6_226 = arith.constant 6 : index
    %511 = vector.load %arg5[%c6_225, %c6_226] : memref<22x22xf32, #tpu.memory_space<vmem>>, vector<16x16xf32>
    %512 = vector.broadcast %510 : f32 to vector<16x16xf32>
    %513 = arith.mulf %512, %511 : vector<16x16xf32>
    %514 = arith.addf %509, %513 : vector<16x16xf32>
    %cst_227 = arith.constant 0.000000e+00 : f32
    %515 = vector.broadcast %cst_227 : f32 to vector<16x16xf32>
    %516 = arith.subf %515, %514 : vector<16x16xf32>
    %517 = math.exp %516 : vector<16x16xf32>
    %cst_228 = arith.constant 1.000000e+00 : f32
    %518 = vector.broadcast %cst_228 : f32 to vector<16x16xf32>
    %519 = arith.addf %518, %517 : vector<16x16xf32>
    %cst_229 = arith.constant 1.000000e+00 : f32
    %520 = vector.broadcast %cst_229 : f32 to vector<16x16xf32>
    %521 = arith.divf %520, %519 : vector<16x16xf32>
    %c0_230 = arith.constant 0 : index
    %c0_231 = arith.constant 0 : index
    %c0_232 = arith.constant 0 : index
    %c0_233 = arith.constant 0 : index
    %522 = vector.load %arg3[%c0_230, %c0_231, %c0_232, %c0_233] : memref<1x1x16x16xf32, #tpu.memory_space<vmem>>, vector<1x1x16x16xf32>
    %523 = vector.shape_cast %522 : vector<1x1x16x16xf32> to vector<16x16xf32>
    %524 = vector.shape_cast %521 : vector<16x16xf32> to vector<1x1x16x16xf32>
    tpu.vector_store %arg3[%c0_230, %c0_231, %c0_232, %c0_233], %524 {strides = array<i32>} : memref<1x1x16x16xf32, #tpu.memory_space<vmem>>, vector<1x1x16x16xf32>,
    return
  }
  func.func @transform_0(%arg0: i32) -> i32 {
    %c0_i32 = arith.constant 0 : i32
    %c0_i32_0 = arith.constant 0 : i32
    return %c0_i32 : i32
  }
  func.func @transform_1(%arg0: i32) -> (i32, i32, i32, i32) {
    %c0_i32 = arith.constant 0 : i32
    %c0_i32_0 = arith.constant 0 : i32
    %c0_i32_1 = arith.constant 0 : i32
    %c0_i32_2 = arith.constant 0 : i32
    return %arg0, %c0_i32, %c0_i32_0, %c0_i32_1 : i32, i32, i32, i32
  }
  func.func @transform_2(%arg0: i32) -> (i32, i32, i32, i32) {
    %c0_i32 = arith.constant 0 : i32
    %c0_i32_0 = arith.constant 0 : i32
    %c0_i32_1 = arith.constant 0 : i32
    %c0_i32_2 = arith.constant 0 : i32
    return %arg0, %c0_i32, %c0_i32_0, %c0_i32_1 : i32, i32, i32, i32
  }
}

</mosaic_0001>

<bundles_post_ra>
// kernel: spatial_attention.1
= control target key start
LH: loop header
LB: loop body
LE: loop exit
PB: predicated region body
PF: predicated region fallthrough
CT: control target
= control target key end

     0   :  { %7 = vsyncpa [#allocation7], 0  ;;  %s2777_s0 = inlined_call_operand.vmem [shape: f32[98], index: 0, kind: input, shape index: {}]   ;;  %s2778_s1 = inlined_call_operand.hbm [shape: f32[2,4,16,16], index: 1, kind: input, shape index: {}]   ;;  %s2779_s2 = inlined_call_operand.hbm [shape: f32[2,1,16,16], index: 2, kind: output, shape index: {}]  }
   0x1   :  { %8 = vsyncpa [#allocation5], 0 }
   0x2   :  { %10 = vsyncpa [#allocation5 + $0x1], 0 }
   0x3   :  { %11 = vsyncpa [#allocation6], 0 }
   0x4   :  { %13 = vsyncpa [#allocation6 + $0x1], 0  ;;  %s1978_s9 = smov 0   ;;  %s1980_s10 = smov 0  }
   0x5   :  { %s1982_s11 = smov 0   ;;  %s1984_s12 = smov 0  }
   0x6 LB: > { %s1999_s13 = sadd.s32 4294967295, %s1946_s12   ;;  %s1633_s14 = sadd.s32 4294967294, %s1946_s12   ;;  %s1946_s12 = sphi %s1984_s12, %s2799_s12   ;;  %s1942_s11 = sphi %s1982_s11, %s2798_s11   ;;  %s1938_s10 = sphi %s1980_s10, %s2797_s10   ;;  %s1934_s9 = sphi %s1978_s9, %s2796_s9  }
   0x7   : > { %s2003_s15 = sadd.s32 1, %s1946_s12   ;;  %s47_s16 = sadd.s32 1, %s1942_s11 }
   0x8   : > { %s44_s17 = ssub.s32 %s1946_s12, %s2003_s15  ;;  %p54_p0 = scmp.ne.s32.totalorder %s1942_s11, %s1938_s10 }
   0x9   : > { %p45_p1 = scmp.eq.s32.totalorder %s44_s17, 0  ;;  %p55_p2 = scmp.eq.s32.totalorder %s1946_s12, 0 }
   0xa   : > { %p60_p3 = scmp.ne.s32.totalorder %s1938_s10, %s1934_s9  ;;  %p2781_p4 = scmp.eq.s32.totalorder %s1999_s13, 0 }
   0xb   : > { %s2015_s18 = scalar_select %p45_p1, %s1942_s11, %s47_s16  }
   0xc   : > { %p2017_p5 = por %p55_p2, %p54_p0  ;;  %p2023_p6 = por %p2781_p4, %p60_p3 }
   0xd   : > { %p84_p7 = scmp.eq.s32.totalorder %s1999_s13, 1  ;;  %p90_p8 = scmp.eq.s32.totalorder %s1633_s14, 1 }
   0xe   : > { %s2784_s20 = scalar_select %p2023_p6, 1, 0 }
   0xf   : > { %p1634_p9 = scmp.ge.s32.totalorder %s1946_s12, 1  ;;  %p97_p10 = scmp.lt.s32.totalorder %s1946_s12, 3 }
  0x10   : > { %p2030_p11 = por %p84_p7, %p54_p0  ;;  %p2034_p12 = por %p90_p8, %p60_p3 }
  0x11   : > { %p2038_p13 = pnand %p1634_p9, %p97_p10  ;;  %s110_s26 = sshll.u32 %s2777_s0, 4  ;;  %s111_s26 = int_to_ptr.vmem [resolvable:$true] %s110_s26 }
  0x12   : > { %s2785_s21 = scalar_select %p2030_p11, 1, 0 }
  0x13   : > { %s2786_s22 = scalar_select %p2034_p12, 1, 0 }
  0x14   : > { %p1762_p1 = pneg %p2038_p13  ;;  %p1775_p2 = scmp.lt.s32.totalorder %s1946_s12, 2 }
  0x15   : > { %s121_s28 = sand.u32 1, %s1942_s11   ;;  %s1831_s3 = scalar_lea.vmem %s111_s26, 16 }
  0x16   : > { %p2051_p7 = pnand %p1762_p1, %p2781_p4  ;;  %p2058_p3 = pnand %p1775_p2, %p2017_p5 }
  0x17   : > { %s1637_s30 = sshll.u32 %s121_s28, 6  ;;  %p1832_p8 = scmp.ne.s32.totalorder %s111_s26, %s1831_s3 }
  0x18   : > { %p1833_p9 = pneg %p2051_p7  ;;  %p1839_p12 = scmp.lt.s32.totalorder %s111_s26, %s111_s26 }
  0x19   : > { %p1840_p11 = scmp.lt.s32.totalorder %s1831_s3, %s1831_s3 }
  0x1a   : > { %p1834_p10 = pnand %p1833_p9, %p1832_p8 }
  0x1b   : > { %p1841_p1 = por %p1840_p11, %p1839_p12 }
  0x1c   : > { %p1835_p0 = pneg %p1834_p10 }
  0x1e   : > { %p1842_p4 = pnand %p1841_p1, %p1835_p0 }
  0x20   : > { %1845 = shalt.err (!%p1842_p4)
}
  0x21   : > { %s1948_s4 = smov [#allocation4]   ;;  %s1752_s5 = sshll.u32 %s1946_s12, 10 }
  0x22   : > { %1765 = dma.vmem_to_smem (!%p2051_p7), %s111_s26, 16, %s1948_s4, [#allocation7]  }
  0x23   : > { %s125_s6 = scalar_lea.vmem [#allocation8], %s1637_s30  ;;  %s2070_s16 = scalar_lea.hbm %s2778_s1, %s1752_s5 }
  0x24   : > { %s132_s7 = sshll.u32 %s125_s6, 4  ;;  %s2074_s17 = scalar_lea.sflag [#allocation5], %s121_s28  ;;  %s2072_s7 = int_to_ptr.vmem [resolvable:$true] %s132_s7 }
  0x25   : > { %s1846_s19 = scalar_lea.hbm %s2070_s16, 1024  ;;  %p1848_p5 = pneg %p2058_p3 }
  0x26   : > { %p1847_p4 = scmp.ne.s32.totalorder %s2070_s16, %s1846_s19  ;;  %s1851_s26 = scalar_lea.hbm %s2778_s1, 2048 }
  0x27   : > { %p1852_p0 = scmp.lt.u32.totalorder %s2070_s16, %s2778_s1  ;;  %p1853_p2 = scmp.lt.u32.totalorder %s1851_s26, %s1846_s19 }
  0x28   : > { %p1849_p11 = pnand %p1848_p5, %p1847_p4  ;;  %p1855_p8 = scmp.lt.u32.totalorder %s1846_s19, %s2070_s16 }
  0x29   : > { %p1854_p7 = por %p1853_p2, %p1852_p0 }
  0x2a   : > { %p1850_p12 = pneg %p1849_p11 }
  0x2b   : > { %p1856_p9 = por %p1855_p8, %p1854_p7 }
  0x2d   : > { %p1857_p10 = pnand %p1856_p9, %p1850_p12 }
  0x2f   : > { %1860 = shalt.err (!%p1857_p10)
}
  0x30   : > { %s1861_s28 = scalar_lea.vmem %s2072_s7, 1024  ;;  %s1949_s3 = smov [#allocation8]  }
  0x31   : > { %p1862_p1 = scmp.ne.s32.totalorder %s2072_s7, %s1861_s28  ;;  %s1866_s4 = sshll.u32 %s1949_s3, 4  ;;  %s1867_s4 = int_to_ptr.vmem [resolvable:$false] %s1866_s4 }
  0x32   : > { %s1868_s5 = scalar_lea.vmem %s1867_s4, 2048  ;;  %p1869_p6 = scmp.lt.s32.totalorder %s2072_s7, %s1867_s4 }
  0x33   : > { %p1864_p4 = pnand %p1862_p1, %p1848_p5  ;;  %p1870_p0 = scmp.lt.s32.totalorder %s1868_s5, %s1861_s28 }
  0x35   : > { %p1865_p11 = pneg %p1864_p4  ;;  %p1871_p2 = por %p1870_p0, %p1869_p6 }
  0x37   : > { %p1872_p7 = pnand %p1871_p2, %p1865_p11 }
  0x39   : > { %1875 = shalt.err (!%p1872_p7)
}
  0x3a   : > { %s1950_s6 = smov 128   ;;  %s1951_s8 = smov 8  }
  0x3b   : > { %1769 = dma.hbm_to_vmem [thread:$0]  (!%p2058_p3), %s2070_s16, 1024, %s2072_s7, %s2074_s17, %s1950_s6, %s1950_s6, %s1951_s8  }
  0x3c   : > { %144 = sbr.rel (%p2038_p13) target bundleno = 704 (0x2c0), region = 28  ;;  %p2790_p5 = scmp.eq.s32.totalorder (!%p2038_p13), %s1999_s13, 0 }
  0x43   : > { %1921 = dma.done.wait (%p2790_p5), [#allocation7], 16   ;;  %p2791_p12 = pmov %p2790_p5 }
  0x44   : > { %s2109_s14 = sand.u32 1, %s1938_s10   ;;  %p2792_p6 = scmp.ne.s32.totalorder %s2784_s20, 0 }
  0x45   : > { %1923 = vsyncadd (%p2791_p12), [#allocation7], 4294967280  ;;  %s1642_s19 = sshll.u32 %s2109_s14, 6  ;;  %s151_s24 = scalar_lea.sflag [#allocation5], %s2109_s14 }
  0x46   : > { %s154_s25 = scalar_lea.vmem [#allocation8], %s1642_s19 }
  0x47   : > { %1925 = dma.done.wait (%p2792_p6), %s151_s24, 1024  }
  0x48   : > { %1927 = vsyncadd (%p2792_p6), %s151_s24, 4294966272 }
  0x49   : > { %159 = sfence }
  0x4a   : > { %v184_v0 = vld [vmem:[%s154_s25] sm:$0xff]  ;;  %v1644_v1 = vld [vmem:[%s154_s25 + $0x10] sm:$0xff]  ;;  %vm176_vm0 = vcmask 179200   ;;  %v185_v4 = vld [vmem:[%s154_s25 + $0x8] sm:$0xff]  ;;  %v1952_v10 = vmov 0.0   ;;  %vm179_vm1 = vcmask 177152  }
  0x4b   : > { %v1646_v2 = vld [vmem:[%s154_s25 + $0x20] sm:$0xff]  ;;  %v189_v3 = vadd.f32 %v1644_v1, %v184_v0  ;;  %v1645_v5 = vld [vmem:[%s154_s25 + $0x18] sm:$0xff]  ;;  %v191_v6 = vmax.f32 %v184_v0, %v1644_v1  ;;  %v1648_v7 = vld [vmem:[%s154_s25 + $0x30] sm:$0xff]  ;;  %177 = vst.msk [vmem:[#allocation2] sm:$0xff] %vm176_vm0, %v1952_v10  ;;  %s1953_s20 = smov 3   ;;  %vm218_vm2 = vcmask 154648  }
  0x4c   : > { %v190_v8 = vadd.f32 %v1645_v5, %v185_v4  ;;  %v1647_v9 = vld [vmem:[%s154_s25 + $0x28] sm:$0xff]  ;;  %178 = vst.msk [vmem:[#allocation2 + $0x8] sm:$0xff] %vm176_vm0, %v1952_v10  ;;  %181 = vst.msk [vmem:[#allocation3] sm:$0xff] %vm176_vm0, %v1952_v10  ;;  %v192_v11 = vmax.f32 %v185_v4, %v1645_v5  ;;  %v1649_v13 = vld [vmem:[%s154_s25 + $0x38] sm:$0xff]  ;;  %s1650_s23 = sld [smem:[#allocation4 + $0x1]]  ;;  %s1651_s29 = sld [smem:[#allocation4 + $0x2]] }
  0x4d   : > { %182 = vst.msk [vmem:[#allocation3 + $0x8] sm:$0xff] %vm176_vm0, %v1952_v10  ;;  %v196_v12 = vadd.f32 %v1646_v2, %v189_v3  ;;  %v198_v14 = vmax.f32 %v191_v6, %v1646_v2  ;;  %s1652_s7 = sld [smem:[#allocation4 + $0x3]]  ;;  %s1653_s16 = sld [smem:[#allocation4 + $0x4]]  ;;  %vm1531_vm3 = vcmask 130048  }
  0x4e   : > { %v197_v15 = vadd.f32 %v1647_v9, %v190_v8  ;;  %180 = vst.msk [vmem:[#allocation2 + $0x10] sm:$0x3f] %vm179_vm1, %v1952_v10  ;;  %183 = vst.msk [vmem:[#allocation3 + $0x10] sm:$0x3f] %vm179_vm1, %v1952_v10  ;;  %v199_v16 = vmax.f32 %v192_v11, %v1647_v9  ;;  %s1954_s17 = smov 127   ;;  %s1654_s26 = sld [smem:[#allocation4 + $0x5]] }
  0x4f   : > { %v203_v17 = vadd.f32 %v1648_v7, %v196_v12  ;;  %v205_v18 = vmax.f32 %v198_v14, %v1648_v7  ;;  %s1955_s27 = smov 126   ;;  %s1655_s30 = sld [smem:[#allocation4 + $0x6]] }
  0x50   : > { %v204_v19 = vadd.f32 %v1649_v13, %v197_v15  ;;  %v206_v21 = vmax.f32 %v199_v16, %v1649_v13  ;;  %s1956_s28 = smov 125   ;;  %s1657_s3 = sld [smem:[#allocation4 + $0x8]] }
  0x51   : > { %v208_v20 = vmul.f32 0.25, %v203_v17  ;;  %223 = vrot.lane.b32.xlu1 %v205_v18, %s1953_s20  ;;  %s1957_s4 = smov 124   ;;  %s1658_s5 = sld [smem:[#allocation4 + $0x9]] }
  0x52   : > { %v209_v22 = vmul.f32 0.25, %v204_v19  ;;  %v240_v27 = vstv %s1650_s23  ;;  %v254_v30 = vstv %s1651_s29  ;;  %s1958_s6 = smov 123   ;;  %s1659_s8 = sld [smem:[#allocation4 + $0xa]] }
  0x53   : > { %212 = vrot.lane.b32.xlu0 %v208_v20, %s1953_s20  ;;  %v268_v34 = vstv %s1652_s7  ;;  %v282_v37 = vstv %s1653_s16  ;;  %s1959_s19 = smov 122   ;;  %s1660_s24 = sld [smem:[#allocation4 + $0xb]] }
  0x54   : > { %v296_v40 = vstv %s1654_s26  ;;  %s1661_s25 = sld [smem:[#allocation4 + $0xc]]  ;;  %s1664_s23 = sld [smem:[#allocation4 + $0xf]] }
  0x55   : > { %225 = vrot.lane.b32.xlu1 %v206_v21, %s1953_s20  ;;  %v310_v43 = vstv %s1655_s30  ;;  %s1665_s29 = sld [smem:[#allocation4 + $0x10]]  ;;  %s1666_s7 = sld [smem:[#allocation4 + $0x11]] }
  0x56   : > { %v332_v47 = vstv %s1657_s3  ;;  %s1667_s16 = sld [smem:[#allocation4 + $0x12]]  ;;  %s1668_s26 = sld [smem:[#allocation4 + $0x13]] }
  0x57   : > { %214 = vrot.lane.b32.xlu0 %v209_v22, %s1953_s20  ;;  %v346_v51 = vstv %s1658_s5  ;;  %s1662_s20 = sld [smem:[#allocation4 + $0xd]]  ;;  %s1669_s30 = sld [smem:[#allocation4 + $0x14]] }
  0x58   : > { %v360_v54 = vstv %s1659_s8  ;;  %s1671_s3 = sld [smem:[#allocation4 + $0x16]]  ;;  %s1672_s5 = sld [smem:[#allocation4 + $0x17]] }
  0x59   : > { %v374_v57 = vstv %s1660_s24  ;;  %s1673_s8 = sld [smem:[#allocation4 + $0x18]]  ;;  %s1674_s24 = sld [smem:[#allocation4 + $0x19]] }
  0x5a   : > { %v388_v60 = vstv %s1661_s25  ;;  %v424_v3 = vstv %s1664_s23  ;;  %s1675_s25 = sld [smem:[#allocation4 + $0x1a]]  ;;  %s1678_s23 = sld [smem:[#allocation4 + $0x1d]] }
  0x5b   : > { %v438_v7 = vstv %s1665_s29  ;;  %v452_v10 = vstv %s1666_s7  ;;  %s1679_s29 = sld [smem:[#allocation4 + $0x1e]]  ;;  %s1680_s7 = sld [smem:[#allocation4 + $0x1f]] }
  0x5c   : > { %v466_v13 = vstv %s1667_s16  ;;  %v480_v16 = vstv %s1668_s26  ;;  %s1681_s16 = sld [smem:[#allocation4 + $0x20]]  ;;  %s1682_s26 = sld [smem:[#allocation4 + $0x21]] }
  0x5d   : > { %v402_v63 = vstv %s1662_s20  ;;  %v494_v19 = vstv %s1669_s30  ;;  %s1676_s20 = sld [smem:[#allocation4 + $0x1b]]  ;;  %s1683_s30 = sld [smem:[#allocation4 + $0x22]] }
  0x5e   : > { %p2793_p3 = scmp.ne.s32.totalorder %s2785_s21, 0 }
  0xc3   : > { %v224_v23 = vpop.permute.xlu1 %223 }
  0xc4   : > { %229 = vst.msk [vmem:[#allocation3 + $0x3] sm:$0xff] %vm218_vm2, %v224_v23  ;;  %v516_v23 = vstv %s1671_s3  ;;  %s1685_s3 = sld [smem:[#allocation4 + $0x24]] }
  0xc5   : > { %v213_v24 = vpop.permute.xlu0 %212 }
  0xc6   : > { %219 = vst.msk [vmem:[#allocation2 + $0x3] sm:$0xff] %vm218_vm2, %v213_v24 }
  0xc7   : > { %v226_v25 = vpop.permute.xlu1 %225 }
  0xc8   : > { %230 = vst.msk [vmem:[#allocation3 + $0xb] sm:$0xff] %vm218_vm2, %v226_v25 }
  0xc9   : > { %v215_v26 = vpop.permute.xlu0 %214 }
  0xca   : > { %220 = vst.msk [vmem:[#allocation2 + $0xb] sm:$0xff] %vm218_vm2, %v215_v26 }
  0xcd   : > { %v2117_v28 = vld [vmem:[#allocation2] sm:$0xff] }
  0xce   : > { %v241_v29 = vmul.f32 %v240_v27, %v2117_v28  ;;  %v255_v33 = vmul.f32 %v254_v30, %v2117_v28  ;;  %v269_v36 = vmul.f32 %v268_v34, %v2117_v28  ;;  %v283_v39 = vmul.f32 %v282_v37, %v2117_v28  ;;  %v2141_v46 = vld [vmem:[#allocation2 + $0x1] sm:$0xff] }
  0xcf   : > { %v297_v42 = vmul.f32 %v296_v40, %v2117_v28  ;;  %v311_v45 = vmul.f32 %v310_v43, %v2117_v28  ;;  %v333_v49 = vmul.f32 %v332_v47, %v2141_v46  ;;  %v347_v53 = vmul.f32 %v346_v51, %v2141_v46  ;;  %v2169_v2 = vld [vmem:[#allocation2 + $0x2] sm:$0xff] }
  0xd0   : > { %245 = vrot.lane.b32.xlu0 %v241_v29, %s1954_s17  ;;  %v361_v56 = vmul.f32 %v360_v54, %v2141_v46  ;;  %v375_v59 = vmul.f32 %v374_v57, %v2141_v46  ;;  %v389_v62 = vmul.f32 %v388_v60, %v2141_v46  ;;  %v403_v1 = vmul.f32 %v402_v63, %v2141_v46  ;;  %v2197_v22 = vld [vmem:[#allocation2 + $0x3] sm:$0xff] }
  0xd1   : > { %v2121_v31 = vld [vmem:[#allocation2 + $0x8] sm:$0xff]  ;;  %v425_v5 = vmul.f32 %v424_v3, %v2169_v2  ;;  %v439_v9 = vmul.f32 %v438_v7, %v2169_v2  ;;  %v453_v12 = vmul.f32 %v452_v10, %v2169_v2  ;;  %v467_v15 = vmul.f32 %v466_v13, %v2169_v2 }
  0xd2   : > { %v242_v32 = vmul.f32 %v240_v27, %v2121_v31  ;;  %v256_v35 = vmul.f32 %v254_v30, %v2121_v31  ;;  %v270_v38 = vmul.f32 %v268_v34, %v2121_v31  ;;  %v284_v41 = vmul.f32 %v282_v37, %v2121_v31  ;;  %v2147_v50 = vld [vmem:[#allocation2 + $0x9] sm:$0xff] }
  0xd3   : > { %v298_v44 = vmul.f32 %v296_v40, %v2121_v31  ;;  %v312_v48 = vmul.f32 %v310_v43, %v2121_v31  ;;  %v334_v52 = vmul.f32 %v332_v47, %v2147_v50  ;;  %v348_v55 = vmul.f32 %v346_v51, %v2147_v50  ;;  %v2175_v6 = vld [vmem:[#allocation2 + $0xa] sm:$0xff] }
  0xd4   : > { %247 = vrot.lane.b32.xlu1 %v242_v32, %s1954_s17  ;;  %259 = vrot.lane.b32.xlu0 %v255_v33, %s1955_s27  ;;  %v362_v58 = vmul.f32 %v360_v54, %v2147_v50  ;;  %v376_v61 = vmul.f32 %v374_v57, %v2147_v50  ;;  %v390_v0 = vmul.f32 %v388_v60, %v2147_v50  ;;  %v2203_v26 = vld [vmem:[#allocation2 + $0xb] sm:$0xff]  ;;  %v530_v27 = vstv %s1672_s5  ;;  %s2249_s5 = sld [smem:[#allocation4 + $0x25]] }
  0xd5   : > { %v404_v4 = vmul.f32 %v402_v63, %v2147_v50  ;;  %v426_v8 = vmul.f32 %v424_v3, %v2175_v6  ;;  %v440_v11 = vmul.f32 %v438_v7, %v2175_v6  ;;  %v454_v14 = vmul.f32 %v452_v10, %v2175_v6 }
  0xd6   : > { %v468_v17 = vmul.f32 %v466_v13, %v2175_v6  ;;  %v481_v18 = vmul.f32 %v480_v16, %v2169_v2  ;;  %v482_v20 = vmul.f32 %v480_v16, %v2175_v6  ;;  %v495_v21 = vmul.f32 %v494_v19, %v2169_v2 }
  0xd7   : > { %v496_v24 = vmul.f32 %v494_v19, %v2175_v6  ;;  %v517_v25 = vmul.f32 %v516_v23, %v2197_v22  ;;  %v518_v29 = vmul.f32 %v516_v23, %v2203_v26  ;;  %v531_v30 = vmul.f32 %v530_v27, %v2197_v22 }
  0xd8   : > { %261 = vrot.lane.b32.xlu1 %v256_v35, %s1955_s27  ;;  %273 = vrot.lane.b32.xlu0 %v269_v36, %s1956_s28  ;;  %v544_v32 = vstv %s1673_s8  ;;  %v532_v33 = vmul.f32 %v530_v27, %v2203_v26  ;;  %v558_v35 = vstv %s1674_s24  ;;  %s2251_s8 = sld [smem:[#allocation4]]  ;;  %s2259_s24 = sld [smem:[#allocation4 + $0x26]] }
  0xd9   : > { %v545_v34 = vmul.f32 %v544_v32, %v2197_v22  ;;  %v546_v36 = vmul.f32 %v544_v32, %v2203_v26  ;;  %v559_v37 = vmul.f32 %v558_v35, %v2197_v22  ;;  %v622_v51 = vstv %s1679_s29  ;;  %s2287_s29 = sld [smem:[#allocation4 + $0x29]] }
  0xda   : > { %v636_v54 = vstv %s1680_s7  ;;  %v650_v57 = vstv %s1681_s16  ;;  %v664_v60 = vstv %s1682_s26  ;;  %v678_v63 = vstv %s1683_s30  ;;  %s2294_s7 = sld [smem:[#allocation4 + $0x2b]]  ;;  %s2303_s16 = sld [smem:[#allocation4 + $0x2c]] }
  0xdb   : > { %s2313_s26 = sld [smem:[#allocation4 + $0x2d]]  ;;  %s2322_s30 = sld [smem:[#allocation4 + $0x2e]] }
  0xdc   : > { %275 = vrot.lane.b32.xlu1 %v270_v38, %s1956_s28  ;;  %287 = vrot.lane.b32.xlu0 %v283_v39, %s1957_s4  ;;  %v572_v38 = vstv %s1675_s25  ;;  %v560_v39 = vmul.f32 %v558_v35, %v2203_v26  ;;  %s2268_s25 = sld [smem:[#allocation4 + $0x27]] }
  0xdd   : > { %v573_v40 = vmul.f32 %v572_v38, %v2197_v22 }
  0xde   : > { %v234_v13 = vstv %s2251_s8  ;;  %v728_v19 = vstv %s2259_s24  ;;  %s2338_s8 = sld [smem:[#allocation4 + $0x30]]  ;;  %s2345_s24 = sld [smem:[#allocation4 + $0x32]] }
  0xdf   : > { %v236_v27 = vmul.f32 %v234_v13, %v2121_v31 }
  0xe0   : > { %289 = vrot.lane.b32.xlu1 %v284_v41, %s1957_s4  ;;  %301 = vrot.lane.b32.xlu0 %v297_v42, %s1958_s6  ;;  %v586_v41 = vstv %s1676_s20  ;;  %v574_v42 = vmul.f32 %v572_v38, %v2203_v26  ;;  %s2277_s20 = sld [smem:[#allocation4 + $0x28]] }
  0xe1   : > { %v587_v43 = vmul.f32 %v586_v41, %v2197_v22  ;;  %v588_v47 = vmul.f32 %v586_v41, %v2203_v26 }
  0xe4   : > { %303 = vrot.lane.b32.xlu1 %v298_v44, %s1958_s6  ;;  %315 = vrot.lane.b32.xlu0 %v311_v45, %s1959_s19  ;;  %v2225_v44 = vld [vmem:[#allocation2 + $0x4] sm:$0xff]  ;;  %v608_v45 = vstv %s1678_s23  ;;  %s2279_s23 = sld [smem:[#allocation4 + $0x7]] }
  0xe5   : > { %v679_v3 = vmul.f32 %v678_v63, %v2225_v44 }
  0xe6   : > { %v756_v38 = vstv %s2277_s20  ;;  %s2364_s20 = sld [smem:[#allocation4 + $0x34]] }
  0xe8   : > { %317 = vrot.lane.b32.xlu1 %v312_v48, %s1959_s19  ;;  %337 = vrot.lane.b32.xlu0 %v333_v49, %s1954_s17  ;;  %v609_v48 = vmul.f32 %v608_v45, %v2225_v44  ;;  %v2231_v49 = vld [vmem:[#allocation2 + $0xc] sm:$0xff] }
  0xec   : > { %339 = vrot.lane.b32.xlu1 %v334_v52, %s1954_s17  ;;  %351 = vrot.lane.b32.xlu0 %v347_v53, %s1955_s27  ;;  %v610_v52 = vmul.f32 %v608_v45, %v2231_v49  ;;  %v623_v53 = vmul.f32 %v622_v51, %v2225_v44 }
  0xf0   : > { %353 = vrot.lane.b32.xlu1 %v348_v55, %s1955_s27  ;;  %365 = vrot.lane.b32.xlu0 %v361_v56, %s1956_s28  ;;  %v624_v55 = vmul.f32 %v622_v51, %v2231_v49  ;;  %v637_v56 = vmul.f32 %v636_v54, %v2225_v44 }
  0xf4   : > { %367 = vrot.lane.b32.xlu1 %v362_v58, %s1956_s28  ;;  %379 = vrot.lane.b32.xlu0 %v375_v59, %s1957_s4  ;;  %v638_v58 = vmul.f32 %v636_v54, %v2231_v49  ;;  %v651_v59 = vmul.f32 %v650_v57, %v2225_v44 }
  0xf8   : > { %381 = vrot.lane.b32.xlu1 %v376_v61, %s1957_s4  ;;  %393 = vrot.lane.b32.xlu0 %v389_v62, %s1958_s6  ;;  %v652_v61 = vmul.f32 %v650_v57, %v2231_v49  ;;  %v665_v62 = vmul.f32 %v664_v60, %v2225_v44 }
  0xfc   : > { %395 = vrot.lane.b32.xlu1 %v390_v0, %s1958_s6  ;;  %407 = vrot.lane.b32.xlu0 %v403_v1, %s1959_s19  ;;  %v666_v1 = vmul.f32 %v664_v60, %v2231_v49  ;;  %v2310_v60 = vld [vmem:[#allocation2 + $0x6] sm:$0xff] }
 0x100   : > { %409 = vrot.lane.b32.xlu1 %v404_v4, %s1959_s19  ;;  %429 = vrot.lane.b32.xlu0 %v425_v5, %s1954_s17  ;;  %v2257_v4 = vld [vmem:[#allocation2 + $0x5] sm:$0xff]  ;;  %v700_v5 = vstv %s1685_s3  ;;  %s2329_s3 = sld [smem:[#allocation4 + $0x2f]] }
 0x101   : > { %v701_v10 = vmul.f32 %v700_v5, %v2257_v4 }
 0x104   : > { %431 = vrot.lane.b32.xlu1 %v426_v8, %s1954_s17  ;;  %443 = vrot.lane.b32.xlu0 %v439_v9, %s1955_s27  ;;  %v680_v9 = vmul.f32 %v678_v63, %v2231_v49 }
 0x108   : > { %445 = vrot.lane.b32.xlu1 %v440_v11, %s1955_s27  ;;  %457 = vrot.lane.b32.xlu0 %v453_v12, %s1956_s28  ;;  %v2265_v11 = vld [vmem:[#allocation2 + $0xd] sm:$0xff]  ;;  %v714_v12 = vstv %s2249_s5  ;;  %s2331_s5 = sld [smem:[#allocation4 + $0xe]] }
 0x109   : > { %v702_v16 = vmul.f32 %v700_v5, %v2265_v11  ;;  %v730_v35 = vmul.f32 %v728_v19, %v2265_v11 }
 0x10c   : > { %459 = vrot.lane.b32.xlu1 %v454_v14, %s1956_s28  ;;  %471 = vrot.lane.b32.xlu0 %v467_v15, %s1957_s4 }
 0x110   : > { %473 = vrot.lane.b32.xlu1 %v468_v17, %s1957_s4  ;;  %485 = vrot.lane.b32.xlu0 %v481_v18, %s1958_s6  ;;  %v715_v17 = vmul.f32 %v714_v12, %v2257_v4  ;;  %v235_v18 = vmul.f32 %v234_v13, %v2117_v28  ;;  %v820_v13 = vstv %s2313_s26  ;;  %s2396_s26 = sld [smem:[#allocation4 + $0x39]] }
 0x114   : > { %487 = vrot.lane.b32.xlu1 %v482_v20, %s1958_s6  ;;  %499 = vrot.lane.b32.xlu0 %v495_v21, %s1959_s19 }
 0x118   : > { %501 = vrot.lane.b32.xlu1 %v496_v24, %s1959_s19  ;;  %521 = vrot.lane.b32.xlu0 %v517_v25, %s1954_s17  ;;  %v716_v24 = vmul.f32 %v714_v12, %v2265_v11  ;;  %v729_v25 = vmul.f32 %v728_v19, %v2257_v4 }
 0x11c   : > { %523 = vrot.lane.b32.xlu1 %v518_v29, %s1954_s17  ;;  %535 = vrot.lane.b32.xlu0 %v531_v30, %s1955_s27  ;;  %v742_v29 = vstv %s2268_s25  ;;  %s2354_s25 = sld [smem:[#allocation4 + $0x33]] }
 0x11d   : > { %v744_v45 = vmul.f32 %v742_v29, %v2265_v11 }
 0x120   : > { %537 = vrot.lane.b32.xlu1 %v532_v33, %s1955_s27  ;;  %549 = vrot.lane.b32.xlu0 %v545_v34, %s1956_s28 }
 0x124   : > { %551 = vrot.lane.b32.xlu1 %v546_v36, %s1956_s28  ;;  %563 = vrot.lane.b32.xlu0 %v559_v37, %s1957_s4  ;;  %v743_v36 = vmul.f32 %v742_v29, %v2257_v4 }
 0x128   : > { %565 = vrot.lane.b32.xlu1 %v560_v39, %s1957_s4  ;;  %577 = vrot.lane.b32.xlu0 %v573_v40, %s1958_s6  ;;  %v326_v39 = vstv %s2279_s23  ;;  %s2373_s23 = sld [smem:[#allocation4 + $0x35]] }
 0x12c   : > { %579 = vrot.lane.b32.xlu1 %v574_v42, %s1958_s6  ;;  %591 = vrot.lane.b32.xlu0 %v587_v43, %s1959_s19 }
 0x130   : > { %593 = vrot.lane.b32.xlu1 %v588_v47, %s1959_s19  ;;  %613 = vrot.lane.b32.xlu0 %v609_v48, %s1954_s17  ;;  %v757_v47 = vmul.f32 %v756_v38, %v2257_v4  ;;  %v327_v48 = vmul.f32 %v326_v39, %v2141_v46  ;;  %v328_v46 = vmul.f32 %v326_v39, %v2147_v50  ;;  %v806_v50 = vstv %s2303_s16  ;;  %s2389_s16 = sld [smem:[#allocation4 + $0x37]] }
 0x131   : > { %v807_v12 = vmul.f32 %v806_v50, %v2310_v60 }
 0x134   : > { %615 = vrot.lane.b32.xlu1 %v610_v52, %s1954_s17  ;;  %627 = vrot.lane.b32.xlu0 %v623_v53, %s1955_s27  ;;  %v770_v53 = vstv %s2287_s29  ;;  %s2380_s29 = sld [smem:[#allocation4 + $0x36]] }
 0x138   : > { %629 = vrot.lane.b32.xlu1 %v624_v55, %s1955_s27  ;;  %641 = vrot.lane.b32.xlu0 %v637_v56, %s1956_s28 }
 0x13c   : > { %643 = vrot.lane.b32.xlu1 %v638_v58, %s1956_s28  ;;  %655 = vrot.lane.b32.xlu0 %v651_v59, %s1957_s4  ;;  %v758_v58 = vmul.f32 %v756_v38, %v2265_v11  ;;  %v771_v59 = vmul.f32 %v770_v53, %v2257_v4 }
 0x140   : > { %657 = vrot.lane.b32.xlu1 %v652_v61, %s1957_s4  ;;  %669 = vrot.lane.b32.xlu0 %v665_v62, %s1958_s6  ;;  %v792_v62 = vstv %s2294_s7  ;;  %s2382_s7 = sld [smem:[#allocation4 + $0x15]] }
 0x141   : > { %v793_v5 = vmul.f32 %v792_v62, %v2310_v60 }
 0x142   : > { %v246_v0 = vpop.permute.xlu0 %245 }
 0x143   : > { %v251_v20 = vadd.f32 %v246_v0, %v235_v18  ;;  %v821_v18 = vmul.f32 %v820_v13, %v2310_v60 }
 0x144   : > { %671 = vrot.lane.b32.xlu1 %v666_v1, %s1958_s6  ;;  %683 = vrot.lane.b32.xlu0 %v679_v3, %s1959_s19  ;;  %v772_v3 = vmul.f32 %v770_v53, %v2265_v11 }
 0x146   : > { %v248_v7 = vpop.permute.xlu1 %247  ;;  %v260_v8 = vpop.permute.xlu0 %259 }
 0x147   : > { %v265_v28 = vadd.f32 %v260_v8, %v251_v20  ;;  %v252_v30 = vadd.f32 %v248_v7, %v236_v27  ;;  %v2319_v7 = vld [vmem:[#allocation2 + $0xe] sm:$0xff]  ;;  %v834_v20 = vstv %s2322_s30  ;;  %s2405_s30 = sld [smem:[#allocation4 + $0x3a]] }
 0x148   : > { %685 = vrot.lane.b32.xlu1 %v680_v9, %s1959_s19  ;;  %705 = vrot.lane.b32.xlu0 %v701_v10, %s1954_s17  ;;  %v794_v10 = vmul.f32 %v792_v62, %v2319_v7  ;;  %v822_v27 = vmul.f32 %v820_v13, %v2319_v7  ;;  %v926_v13 = vstv %s2373_s23  ;;  %s2456_s23 = sld [smem:[#allocation4 + $0x41]] }
 0x14a   : > { %v262_v14 = vpop.permute.xlu1 %261  ;;  %v274_v15 = vpop.permute.xlu0 %273 }
 0x14b   : > { %v279_v32 = vadd.f32 %v274_v15, %v265_v28  ;;  %v266_v37 = vadd.f32 %v262_v14, %v252_v30  ;;  %v835_v28 = vmul.f32 %v834_v20, %v2310_v60 }
 0x14c   : > { %707 = vrot.lane.b32.xlu1 %v702_v16, %s1954_s17  ;;  %719 = vrot.lane.b32.xlu0 %v715_v17, %s1955_s27  ;;  %v808_v17 = vmul.f32 %v806_v50, %v2319_v7 }
 0x14e   : > { %v276_v21 = vpop.permute.xlu1 %275  ;;  %v288_v23 = vpop.permute.xlu0 %287 }
 0x14f   : > { %v293_v31 = vadd.f32 %v288_v23, %v279_v32  ;;  %v280_v40 = vadd.f32 %v276_v21, %v266_v37  ;;  %v848_v32 = vstv %s2329_s3  ;;  %s2415_s3 = sld [smem:[#allocation4 + $0x3b]] }
 0x150   : > { %721 = vrot.lane.b32.xlu1 %v716_v24, %s1955_s27  ;;  %733 = vrot.lane.b32.xlu0 %v729_v25, %s1956_s28  ;;  %v849_v38 = vmul.f32 %v848_v32, %v2310_v60 }
 0x152   : > { %v290_v33 = vpop.permute.xlu1 %289  ;;  %v302_v34 = vpop.permute.xlu0 %301 }
 0x153   : > { %v307_v41 = vadd.f32 %v302_v34, %v293_v31  ;;  %v294_v51 = vadd.f32 %v290_v33, %v280_v40  ;;  %v418_v33 = vstv %s2331_s5  ;;  %v836_v31 = vmul.f32 %v834_v20, %v2319_v7  ;;  %s2424_s5 = sld [smem:[#allocation4 + $0x3c]] }
 0x154   : > { %735 = vrot.lane.b32.xlu1 %v730_v35, %s1956_s28  ;;  %747 = vrot.lane.b32.xlu0 %v743_v36, %s1957_s4  ;;  %v419_v39 = vmul.f32 %v418_v33, %v2169_v2  ;;  %v420_v2 = vmul.f32 %v418_v33, %v2175_v6  ;;  %v898_v6 = vstv %s2354_s25  ;;  %s2440_s25 = sld [smem:[#allocation4 + $0x3e]] }
 0x156   : > { %v304_v42 = vpop.permute.xlu1 %303  ;;  %v316_v43 = vpop.permute.xlu0 %315 }
 0x157   : > { %v321_v52 = vadd.f32 %v316_v43, %v307_v41  ;;  %v308_v54 = vadd.f32 %v304_v42, %v294_v51  ;;  %v862_v42 = vstv %s2338_s8  ;;  %v850_v51 = vmul.f32 %v848_v32, %v2319_v7  ;;  %s2431_s8 = sld [smem:[#allocation4 + $0x3d]] }
 0x158   : > { %749 = vrot.lane.b32.xlu1 %v744_v45, %s1957_s4  ;;  %761 = vrot.lane.b32.xlu0 %v757_v47, %s1958_s6 }
 0x159   : > { %v329_v55 = vadd.f32 %v327_v48, %v321_v52  ;;  %v863_v52 = vmul.f32 %v862_v42, %v2310_v60 }
 0x15a   : > { %v318_v56 = vpop.permute.xlu1 %317  ;;  %v338_v57 = vpop.permute.xlu0 %337 }
 0x15b   : > { %v322_v61 = vadd.f32 %v318_v56, %v308_v54  ;;  %v343_v14 = vadd.f32 %v338_v57, %v329_v55  ;;  %v2361_v54 = vld [vmem:[#allocation3] sm:$0xff]  ;;  %v884_v55 = vstv %s2345_s24  ;;  %s2433_s24 = sld [smem:[#allocation4 + $0x1c]] }
 0x15c   : > { %763 = vrot.lane.b32.xlu1 %v758_v58, %s1958_s6  ;;  %775 = vrot.lane.b32.xlu0 %v771_v59, %s1959_s19  ;;  %v864_v59 = vmul.f32 %v862_v42, %v2319_v7 }
 0x15d   : > { %v330_v63 = vadd.f32 %v328_v46, %v322_v61  ;;  %v885_v46 = vmul.f32 %v884_v55, %v2361_v54  ;;  %v2370_v61 = vld [vmem:[#allocation3 + $0x8] sm:$0xff] }
 0x15e   : > { %v340_v0 = vpop.permute.xlu1 %339  ;;  %v352_v1 = vpop.permute.xlu0 %351 }
 0x15f   : > { %v357_v19 = vadd.f32 %v352_v1, %v343_v14  ;;  %v344_v21 = vadd.f32 %v340_v0, %v330_v63  ;;  %v886_v0 = vmul.f32 %v884_v55, %v2370_v61  ;;  %v899_v1 = vmul.f32 %v898_v6, %v2361_v54 }
 0x160   : > { %777 = vrot.lane.b32.xlu1 %v772_v3, %s1959_s19  ;;  %797 = vrot.lane.b32.xlu0 %v793_v5, %s1954_s17  ;;  %v912_v3 = vstv %s2364_s20  ;;  %s2447_s20 = sld [smem:[#allocation4 + $0x40]] }
 0x162   : > { %v354_v8 = vpop.permute.xlu1 %353  ;;  %v366_v9 = vpop.permute.xlu0 %365 }
 0x163   : > { %v371_v23 = vadd.f32 %v366_v9, %v357_v19  ;;  %v358_v29 = vadd.f32 %v354_v8, %v344_v21  ;;  %v900_v9 = vmul.f32 %v898_v6, %v2370_v61  ;;  %v927_v19 = vmul.f32 %v926_v13, %v2361_v54 }
 0x164   : > { %799 = vrot.lane.b32.xlu1 %v794_v10, %s1954_s17  ;;  %811 = vrot.lane.b32.xlu0 %v807_v12, %s1955_s27  ;;  %v913_v10 = vmul.f32 %v912_v3, %v2361_v54 }
 0x166   : > { %v368_v15 = vpop.permute.xlu1 %367  ;;  %v380_v16 = vpop.permute.xlu0 %379 }
 0x167   : > { %v385_v30 = vadd.f32 %v380_v16, %v371_v23  ;;  %v372_v34 = vadd.f32 %v368_v15, %v358_v29  ;;  %v940_v23 = vstv %s2380_s29  ;;  %s2466_s29 = sld [smem:[#allocation4 + $0x42]] }
 0x168   : > { %813 = vrot.lane.b32.xlu1 %v808_v17, %s1955_s27  ;;  %825 = vrot.lane.b32.xlu0 %v821_v18, %s1956_s28  ;;  %v914_v18 = vmul.f32 %v912_v3, %v2370_v61  ;;  %v941_v32 = vmul.f32 %v940_v23, %v2361_v54  ;;  %v1018_v3 = vstv %s2424_s5  ;;  %s2507_s5 = sld [smem:[#allocation4 + $0x48]] }
 0x16a   : > { %v382_v24 = vpop.permute.xlu1 %381  ;;  %v394_v25 = vpop.permute.xlu0 %393 }
 0x16b   : > { %v399_v35 = vadd.f32 %v394_v25, %v385_v30  ;;  %v386_v40 = vadd.f32 %v382_v24, %v372_v34  ;;  %v510_v24 = vstv %s2382_s7  ;;  %v928_v30 = vmul.f32 %v926_v13, %v2370_v61  ;;  %s2475_s7 = sld [smem:[#allocation4 + $0x43]] }
 0x16c   : > { %827 = vrot.lane.b32.xlu1 %v822_v27, %s1956_s28  ;;  %839 = vrot.lane.b32.xlu0 %v835_v28, %s1957_s4  ;;  %v511_v33 = vmul.f32 %v510_v24, %v2197_v22  ;;  %v512_v22 = vmul.f32 %v510_v24, %v2203_v26  ;;  %v990_v26 = vstv %s2405_s30  ;;  %s2491_s30 = sld [smem:[#allocation4 + $0x45]] }
 0x16e   : > { %v396_v36 = vpop.permute.xlu1 %395  ;;  %v408_v37 = vpop.permute.xlu0 %407 }
 0x16f   : > { %v413_v41 = vadd.f32 %v408_v37, %v399_v35  ;;  %v400_v43 = vadd.f32 %v396_v36, %v386_v40  ;;  %v954_v36 = vstv %s2389_s16  ;;  %v942_v40 = vmul.f32 %v940_v23, %v2370_v61  ;;  %s2482_s16 = sld [smem:[#allocation4 + $0x44]] }
 0x170   : > { %841 = vrot.lane.b32.xlu1 %v836_v31, %s1957_s4  ;;  %853 = vrot.lane.b32.xlu0 %v849_v38, %s1958_s6 }
 0x171   : > { %v421_v45 = vadd.f32 %v419_v39, %v413_v41  ;;  %v955_v41 = vmul.f32 %v954_v36, %v2361_v54 }
 0x172   : > { %v410_v47 = vpop.permute.xlu1 %409  ;;  %v430_v48 = vpop.permute.xlu0 %429 }
 0x173   : > { %v414_v53 = vadd.f32 %v410_v47, %v400_v43  ;;  %v435_v5 = vadd.f32 %v430_v48, %v421_v45  ;;  %v2412_v43 = vld [vmem:[#allocation3 + $0x1] sm:$0xff]  ;;  %v976_v45 = vstv %s2396_s26  ;;  %s2484_s26 = sld [smem:[#allocation4 + $0x23]] }
 0x174   : > { %855 = vrot.lane.b32.xlu1 %v850_v51, %s1958_s6  ;;  %867 = vrot.lane.b32.xlu0 %v863_v52, %s1959_s19  ;;  %v956_v52 = vmul.f32 %v954_v36, %v2370_v61 }
 0x175   : > { %v422_v56 = vadd.f32 %v420_v2, %v414_v53  ;;  %v977_v2 = vmul.f32 %v976_v45, %v2412_v43  ;;  %v2421_v53 = vld [vmem:[#allocation3 + $0x9] sm:$0xff] }
 0x176   : > { %v432_v57 = vpop.permute.xlu1 %431  ;;  %v444_v58 = vpop.permute.xlu0 %443 }
 0x177   : > { %v449_v12 = vadd.f32 %v444_v58, %v435_v5  ;;  %v436_v14 = vadd.f32 %v432_v57, %v422_v56  ;;  %v978_v57 = vmul.f32 %v976_v45, %v2421_v53  ;;  %v991_v58 = vmul.f32 %v990_v26, %v2412_v43 }
 0x178   : > { %869 = vrot.lane.b32.xlu1 %v864_v59, %s1959_s19  ;;  %889 = vrot.lane.b32.xlu0 %v885_v46, %s1954_s17  ;;  %v1004_v59 = vstv %s2415_s3  ;;  %s2498_s3 = sld [smem:[#allocation4 + $0x47]] }
 0x17a   : > { %v446_v62 = vpop.permute.xlu1 %445  ;;  %v458_v63 = vpop.permute.xlu0 %457 }
 0x17b   : > { %v463_v15 = vadd.f32 %v458_v63, %v449_v12  ;;  %v450_v20 = vadd.f32 %v446_v62, %v436_v14  ;;  %v992_v63 = vmul.f32 %v990_v26, %v2421_v53  ;;  %v1019_v12 = vmul.f32 %v1018_v3, %v2412_v43 }
 0x17c   : > { %891 = vrot.lane.b32.xlu1 %v886_v0, %s1954_s17  ;;  %903 = vrot.lane.b32.xlu0 %v899_v1, %s1955_s27  ;;  %v1005_v0 = vmul.f32 %v1004_v59, %v2412_v43 }
 0x17e   : > { %v460_v50 = vpop.permute.xlu1 %459  ;;  %v472_v8 = vpop.permute.xlu0 %471 }
 0x17f   : > { %v477_v21 = vadd.f32 %v472_v8, %v463_v15  ;;  %v464_v25 = vadd.f32 %v460_v50, %v450_v20  ;;  %v1032_v15 = vstv %s2431_s8  ;;  %s2517_s8 = sld [smem:[#allocation4 + $0x49]] }
 0x180   : > { %905 = vrot.lane.b32.xlu1 %v900_v9, %s1955_s27  ;;  %917 = vrot.lane.b32.xlu0 %v913_v10, %s1956_s28  ;;  %v1006_v10 = vmul.f32 %v1004_v59, %v2421_v53  ;;  %v1033_v23 = vmul.f32 %v1032_v15, %v2412_v43  ;;  %v1110_v59 = vstv %s2475_s7  ;;  %s2558_s7 = sld [smem:[#allocation4 + $0x4f]] }
 0x182   : > { %v474_v16 = vpop.permute.xlu1 %473  ;;  %v486_v17 = vpop.permute.xlu0 %485 }
 0x183   : > { %v491_v27 = vadd.f32 %v486_v17, %v477_v21  ;;  %v478_v34 = vadd.f32 %v474_v16, %v464_v25  ;;  %v602_v16 = vstv %s2433_s24  ;;  %v1020_v21 = vmul.f32 %v1018_v3, %v2421_v53  ;;  %s2526_s24 = sld [smem:[#allocation4 + $0x4a]] }
 0x184   : > { %919 = vrot.lane.b32.xlu1 %v914_v18, %s1956_s28  ;;  %931 = vrot.lane.b32.xlu0 %v927_v19, %s1957_s4  ;;  %v603_v24 = vmul.f32 %v602_v16, %v2225_v44  ;;  %v604_v44 = vmul.f32 %v602_v16, %v2231_v49  ;;  %v1082_v49 = vstv %s2456_s23  ;;  %s2542_s23 = sld [smem:[#allocation4 + $0x4c]] }
 0x186   : > { %v488_v28 = vpop.permute.xlu1 %487  ;;  %v500_v29 = vpop.permute.xlu0 %499 }
 0x187   : > { %v505_v35 = vadd.f32 %v500_v29, %v491_v27  ;;  %v492_v37 = vadd.f32 %v488_v28, %v478_v34  ;;  %v1046_v28 = vstv %s2440_s25  ;;  %v1034_v34 = vmul.f32 %v1032_v15, %v2421_v53  ;;  %s2533_s25 = sld [smem:[#allocation4 + $0x4b]] }
 0x188   : > { %933 = vrot.lane.b32.xlu1 %v928_v30, %s1957_s4  ;;  %945 = vrot.lane.b32.xlu0 %v941_v32, %s1958_s6 }
 0x189   : > { %v513_v31 = vadd.f32 %v511_v33, %v505_v35  ;;  %v1047_v35 = vmul.f32 %v1046_v28, %v2412_v43 }
 0x18a   : > { %v502_v38 = vpop.permute.xlu1 %501  ;;  %v522_v39 = vpop.permute.xlu0 %521 }
 0x18b   : > { %v506_v42 = vadd.f32 %v502_v38, %v492_v37  ;;  %v527_v46 = vadd.f32 %v522_v39, %v513_v31  ;;  %v2463_v37 = vld [vmem:[#allocation3 + $0x2] sm:$0xff]  ;;  %v1068_v31 = vstv %s2447_s20  ;;  %s2535_s20 = sld [smem:[#allocation4 + $0x2a]] }
 0x18c   : > { %947 = vrot.lane.b32.xlu1 %v942_v40, %s1958_s6  ;;  %959 = vrot.lane.b32.xlu0 %v955_v41, %s1959_s19  ;;  %v1048_v41 = vmul.f32 %v1046_v28, %v2421_v53 }
 0x18d   : > { %v514_v47 = vadd.f32 %v512_v22, %v506_v42  ;;  %v1069_v22 = vmul.f32 %v1068_v31, %v2463_v37  ;;  %v2472_v42 = vld [vmem:[#allocation3 + $0xa] sm:$0xff] }
 0x18e   : > { %v524_v48 = vpop.permute.xlu1 %523  ;;  %v536_v51 = vpop.permute.xlu0 %535 }
 0x18f   : > { %v541_v1 = vadd.f32 %v536_v51, %v527_v46  ;;  %v528_v5 = vadd.f32 %v524_v48, %v514_v47  ;;  %v1070_v48 = vmul.f32 %v1068_v31, %v2472_v42  ;;  %v1083_v51 = vmul.f32 %v1082_v49, %v2463_v37 }
 0x190   : > { %961 = vrot.lane.b32.xlu1 %v956_v52, %s1959_s19  ;;  %981 = vrot.lane.b32.xlu0 %v977_v2, %s1954_s17  ;;  %v1096_v52 = vstv %s2466_s29  ;;  %s2549_s29 = sld [smem:[#allocation4 + $0x4e]] }
 0x192   : > { %v538_v55 = vpop.permute.xlu1 %537  ;;  %v550_v56 = vpop.permute.xlu0 %549 }
 0x193   : > { %v555_v50 = vadd.f32 %v550_v56, %v541_v1  ;;  %v542_v13 = vadd.f32 %v538_v55, %v528_v5  ;;  %v1084_v56 = vmul.f32 %v1082_v49, %v2472_v42  ;;  %v1111_v1 = vmul.f32 %v1110_v59, %v2463_v37 }
 0x194   : > { %983 = vrot.lane.b32.xlu1 %v978_v57, %s1954_s17  ;;  %995 = vrot.lane.b32.xlu0 %v991_v58, %s1955_s27  ;;  %v1097_v57 = vmul.f32 %v1096_v52, %v2463_v37 }
 0x196   : > { %v552_v6 = vpop.permute.xlu1 %551  ;;  %v564_v62 = vpop.permute.xlu0 %563 }
 0x197   : > { %v569_v14 = vadd.f32 %v564_v62, %v555_v50  ;;  %v556_v17 = vadd.f32 %v552_v6, %v542_v13  ;;  %v1124_v50 = vstv %s2482_s16  ;;  %s2568_s16 = sld [smem:[#allocation4 + $0x50]] }
 0x198   : > { %997 = vrot.lane.b32.xlu1 %v992_v63, %s1955_s27  ;;  %1009 = vrot.lane.b32.xlu0 %v1005_v0, %s1956_s28  ;;  %v1098_v0 = vmul.f32 %v1096_v52, %v2472_v42  ;;  %v1125_v15 = vmul.f32 %v1124_v50, %v2463_v37  ;;  %v1202_v52 = vstv %s2526_s24  ;;  %s2609_s24 = sld [smem:[#allocation4 + $0x56]] }
 0x19a   : > { %v566_v8 = vpop.permute.xlu1 %565  ;;  %v578_v9 = vpop.permute.xlu0 %577 }
 0x19b   : > { %v583_v18 = vadd.f32 %v578_v9, %v569_v14  ;;  %v570_v25 = vadd.f32 %v566_v8, %v556_v17  ;;  %v694_v8 = vstv %s2484_s26  ;;  %v1112_v14 = vmul.f32 %v1110_v59, %v2472_v42  ;;  %s2577_s26 = sld [smem:[#allocation4 + $0x51]] }
 0x19c   : > { %1011 = vrot.lane.b32.xlu1 %v1006_v10, %s1956_s28  ;;  %1023 = vrot.lane.b32.xlu0 %v1019_v12, %s1957_s4  ;;  %v695_v16 = vmul.f32 %v694_v8, %v2257_v4  ;;  %v696_v4 = vmul.f32 %v694_v8, %v2265_v11  ;;  %v1174_v11 = vstv %s2507_s5  ;;  %s2593_s5 = sld [smem:[#allocation4 + $0x53]] }
 0x19e   : > { %v580_v19 = vpop.permute.xlu1 %579  ;;  %v592_v20 = vpop.permute.xlu0 %591 }
 0x19f   : > { %v597_v27 = vadd.f32 %v592_v20, %v583_v18  ;;  %v584_v29 = vadd.f32 %v580_v19, %v570_v25  ;;  %v1138_v19 = vstv %s2491_s30  ;;  %v1126_v25 = vmul.f32 %v1124_v50, %v2472_v42  ;;  %s2584_s30 = sld [smem:[#allocation4 + $0x52]] }
 0x1a0   : > { %1025 = vrot.lane.b32.xlu1 %v1020_v21, %s1957_s4  ;;  %1037 = vrot.lane.b32.xlu0 %v1033_v23, %s1958_s6 }
 0x1a1   : > { %v605_v30 = vadd.f32 %v603_v24, %v597_v27  ;;  %v1139_v27 = vmul.f32 %v1138_v19, %v2463_v37 }
 0x1a2   : > { %v594_v32 = vpop.permute.xlu1 %593  ;;  %v614_v33 = vpop.permute.xlu0 %613 }
 0x1a3   : > { %v598_v36 = vadd.f32 %v594_v32, %v584_v29  ;;  %v619_v2 = vadd.f32 %v614_v33, %v605_v30  ;;  %v2514_v29 = vld [vmem:[#allocation3 + $0x3] sm:$0xff]  ;;  %v1160_v30 = vstv %s2498_s3  ;;  %s2588_s3 = sld [smem:[#allocation4 + $0x31]] }
 0x1a4   : > { %1039 = vrot.lane.b32.xlu1 %v1034_v34, %s1958_s6  ;;  %1051 = vrot.lane.b32.xlu0 %v1047_v35, %s1959_s19  ;;  %v1140_v35 = vmul.f32 %v1138_v19, %v2472_v42 }
 0x1a5   : > { %v606_v38 = vadd.f32 %v604_v44, %v598_v36  ;;  %v1161_v44 = vmul.f32 %v1160_v30, %v2514_v29  ;;  %v2523_v36 = vld [vmem:[#allocation3 + $0xb] sm:$0xff] }
 0x1a6   : > { %v616_v39 = vpop.permute.xlu1 %615  ;;  %v628_v40 = vpop.permute.xlu0 %627 }
 0x1a7   : > { %v633_v58 = vadd.f32 %v628_v40, %v619_v2  ;;  %v620_v46 = vadd.f32 %v616_v39, %v606_v38  ;;  %v1162_v39 = vmul.f32 %v1160_v30, %v2523_v36  ;;  %v1175_v40 = vmul.f32 %v1174_v11, %v2514_v29 }
 0x1a8   : > { %1053 = vrot.lane.b32.xlu1 %v1048_v41, %s1959_s19  ;;  %1073 = vrot.lane.b32.xlu0 %v1069_v22, %s1954_s17  ;;  %v1188_v41 = vstv %s2517_s8  ;;  %s2600_s8 = sld [smem:[#allocation4 + $0x55]] }
 0x1aa   : > { %v630_v45 = vpop.permute.xlu1 %629  ;;  %v642_v47 = vpop.permute.xlu0 %641 }
 0x1ab   : > { %v647_v6 = vadd.f32 %v642_v47, %v633_v58  ;;  %v634_v3 = vadd.f32 %v630_v45, %v620_v46  ;;  %v1176_v47 = vmul.f32 %v1174_v11, %v2523_v36  ;;  %v1203_v58 = vmul.f32 %v1202_v52, %v2514_v29 }
 0x1ac   : > { %1075 = vrot.lane.b32.xlu1 %v1070_v48, %s1954_s17  ;;  %1087 = vrot.lane.b32.xlu0 %v1083_v51, %s1955_s27  ;;  %v1189_v48 = vmul.f32 %v1188_v41, %v2514_v29 }
 0x1ae   : > { %v644_v26 = vpop.permute.xlu1 %643  ;;  %v656_v55 = vpop.permute.xlu0 %655 }
 0x1af   : > { %v661_v5 = vadd.f32 %v656_v55, %v647_v6  ;;  %v648_v9 = vadd.f32 %v644_v26, %v634_v3  ;;  %v1216_v6 = vstv %s2533_s25  ;;  %s2619_s25 = sld [smem:[#allocation4 + $0x57]] }
 0x1b0   : > { %1089 = vrot.lane.b32.xlu1 %v1084_v56, %s1955_s27  ;;  %1101 = vrot.lane.b32.xlu0 %v1097_v57, %s1956_s28  ;;  %v1190_v57 = vmul.f32 %v1188_v41, %v2523_v36  ;;  %v1217_v50 = vmul.f32 %v1216_v6, %v2514_v29 }
 0x1b2   : > { %v658_v62 = vpop.permute.xlu1 %657  ;;  %v670_v63 = vpop.permute.xlu0 %669 }
 0x1b3   : > { %v675_v10 = vadd.f32 %v670_v63, %v661_v5  ;;  %v662_v17 = vadd.f32 %v658_v62, %v648_v9  ;;  %v786_v62 = vstv %s2535_s20  ;;  %v1204_v5 = vmul.f32 %v1202_v52, %v2523_v36  ;;  %s2628_s20 = sld [smem:[#allocation4 + $0x58]] }
 0x1b4   : > { %1103 = vrot.lane.b32.xlu1 %v1098_v0, %s1956_s28  ;;  %1115 = vrot.lane.b32.xlu0 %v1111_v1, %s1957_s4  ;;  %v787_v8 = vmul.f32 %v786_v62, %v2310_v60  ;;  %v788_v60 = vmul.f32 %v786_v62, %v2319_v7 }
 0x1b6   : > { %v672_v12 = vpop.permute.xlu1 %671  ;;  %v684_v13 = vpop.permute.xlu0 %683 }
 0x1b7   : > { %v689_v18 = vadd.f32 %v684_v13, %v675_v10  ;;  %v676_v20 = vadd.f32 %v672_v12, %v662_v17  ;;  %v1230_v12 = vstv %s2542_s23  ;;  %v1218_v17 = vmul.f32 %v1216_v6, %v2523_v36  ;;  %s2635_s23 = sld [smem:[#allocation4 + $0x59]] }
 0x1b8   : > { %1117 = vrot.lane.b32.xlu1 %v1112_v14, %s1957_s4  ;;  %1129 = vrot.lane.b32.xlu0 %v1125_v15, %s1958_s6 }
 0x1b9   : > { %v697_v21 = vadd.f32 %v695_v16, %v689_v18  ;;  %v1231_v18 = vmul.f32 %v1230_v12, %v2514_v29 }
 0x1ba   : > { %v686_v23 = vpop.permute.xlu1 %685  ;;  %v706_v24 = vpop.permute.xlu0 %705 }
 0x1bb   : > { %v690_v28 = vadd.f32 %v686_v23, %v676_v20  ;;  %v711_v22 = vadd.f32 %v706_v24, %v697_v21  ;;  %v2565_v21 = vld [vmem:[#allocation3 + $0x4] sm:$0xff]  ;;  %v1252_v23 = vstv %s2549_s29  ;;  %s2639_s29 = sld [smem:[#allocation4 + $0x38]] }
 0x1bc   : > { %1131 = vrot.lane.b32.xlu1 %v1126_v25, %s1958_s6  ;;  %1143 = vrot.lane.b32.xlu0 %v1139_v27, %s1959_s19  ;;  %v1253_v7 = vmul.f32 %v1252_v23, %v2565_v21 }
 0x1bd   : > { %v698_v32 = vadd.f32 %v696_v4, %v690_v28  ;;  %v1232_v4 = vmul.f32 %v1230_v12, %v2523_v36 }
 0x1be   : > { %v708_v33 = vpop.permute.xlu1 %707  ;;  %v720_v34 = vpop.permute.xlu0 %719 }
 0x1bf   : > { %v725_v51 = vadd.f32 %v720_v34, %v711_v22  ;;  %v712_v2 = vadd.f32 %v708_v33, %v698_v32  ;;  %v2574_v32 = vld [vmem:[#allocation3 + $0xc] sm:$0xff]  ;;  %v1266_v33 = vstv %s2558_s7  ;;  %s2644_s7 = sld [smem:[#allocation4 + $0x5a]] }
 0x1c0   : > { %1145 = vrot.lane.b32.xlu1 %v1140_v35, %s1959_s19  ;;  %1165 = vrot.lane.b32.xlu0 %v1161_v44, %s1954_s17  ;;  %v1254_v44 = vmul.f32 %v1252_v23, %v2574_v32  ;;  %v1267_v11 = vmul.f32 %v1266_v33, %v2565_v21  ;;  %v1268_v22 = vmul.f32 %v1266_v33, %v2574_v32  ;;  %v2625_v23 = vld [vmem:[#allocation3 + $0xd] sm:$0xff]  ;;  %v1372_v33 = vstv %s2619_s25 }
 0x1c2   : > { %v722_v31 = vpop.permute.xlu1 %721  ;;  %v734_v38 = vpop.permute.xlu0 %733 }
 0x1c3   : > { %v739_v26 = vadd.f32 %v734_v38, %v725_v51  ;;  %v726_v59 = vadd.f32 %v722_v31, %v712_v2 }
 0x1c4   : > { %1167 = vrot.lane.b32.xlu1 %v1162_v39, %s1954_s17  ;;  %1179 = vrot.lane.b32.xlu0 %v1175_v40, %s1955_s27  ;;  %v1280_v39 = vstv %s2568_s16  ;;  %s2651_s16 = sld [smem:[#allocation4 + $0x5c]] }
 0x1c5   : > { %v1282_v2 = vmul.f32 %v1280_v39, %v2574_v32 }
 0x1c6   : > { %v736_v49 = vpop.permute.xlu1 %735  ;;  %v748_v45 = vpop.permute.xlu0 %747 }
 0x1c7   : > { %v753_v46 = vadd.f32 %v748_v45, %v739_v26  ;;  %v740_v63 = vadd.f32 %v736_v49, %v726_v59  ;;  %v1281_v49 = vmul.f32 %v1280_v39, %v2565_v21  ;;  %v1386_v39 = vstv %s2628_s20 }
 0x1c8   : > { %1181 = vrot.lane.b32.xlu1 %v1176_v47, %s1955_s27  ;;  %1193 = vrot.lane.b32.xlu0 %v1189_v48, %s1956_s28  ;;  %v1294_v48 = vstv %s2577_s26  ;;  %s2660_s26 = sld [smem:[#allocation4 + $0x5d]] }
 0x1c9   : > { %v1295_v26 = vmul.f32 %v1294_v48, %v2565_v21  ;;  %v1296_v6 = vmul.f32 %v1294_v48, %v2574_v32  ;;  %v970_v48 = vstv %s2639_s29 }
 0x1ca   : > { %v750_v55 = vpop.permute.xlu1 %749  ;;  %v762_v56 = vpop.permute.xlu0 %761 }
 0x1cb   : > { %v767_v0 = vadd.f32 %v762_v56, %v753_v46  ;;  %v754_v9 = vadd.f32 %v750_v55, %v740_v63 }
 0x1cc   : > { %1195 = vrot.lane.b32.xlu1 %v1190_v57, %s1956_s28  ;;  %1207 = vrot.lane.b32.xlu0 %v1203_v58, %s1957_s4  ;;  %v1308_v57 = vstv %s2584_s30  ;;  %v878_v58 = vstv %s2588_s3  ;;  %s2670_s30 = sld [smem:[#allocation4 + $0x5e]]  ;;  %s2679_s3 = sld [smem:[#allocation4 + $0x5f]] }
 0x1cd   : > { %v1309_v62 = vmul.f32 %v1308_v57, %v2565_v21  ;;  %v880_v12 = vmul.f32 %v878_v58, %v2370_v61 }
 0x1ce   : > { %v764_v1 = vpop.permute.xlu1 %763  ;;  %v776_v3 = vpop.permute.xlu0 %775 }
 0x1cf   : > { %v781_v10 = vadd.f32 %v776_v3, %v767_v0  ;;  %v768_v13 = vadd.f32 %v764_v1, %v754_v9  ;;  %v879_v0 = vmul.f32 %v878_v58, %v2361_v54  ;;  %v1322_v3 = vstv %s2593_s5  ;;  %s2686_s5 = sld [smem:[#allocation4 + $0x60]] }
 0x1d0   : > { %1209 = vrot.lane.b32.xlu1 %v1204_v5, %s1957_s4  ;;  %1221 = vrot.lane.b32.xlu0 %v1217_v50, %s1958_s6  ;;  %v1310_v9 = vmul.f32 %v1308_v57, %v2574_v32  ;;  %v1414_v58 = vstv %s2644_s7 }
 0x1d1   : > { %v789_v14 = vadd.f32 %v787_v8, %v781_v10  ;;  %v1323_v10 = vmul.f32 %v1322_v3, %v2565_v21 }
 0x1d2   : > { %v778_v15 = vpop.permute.xlu1 %777  ;;  %v798_v16 = vpop.permute.xlu0 %797 }
 0x1d3   : > { %v782_v19 = vadd.f32 %v778_v15, %v768_v13  ;;  %v803_v20 = vadd.f32 %v798_v16, %v789_v14  ;;  %v2616_v14 = vld [vmem:[#allocation3 + $0x5] sm:$0xff]  ;;  %v1344_v15 = vstv %s2600_s8  ;;  %s2690_s8 = sld [smem:[#allocation4 + $0x3f]] }
 0x1d4   : > { %1223 = vrot.lane.b32.xlu1 %v1218_v17, %s1958_s6  ;;  %1235 = vrot.lane.b32.xlu0 %v1231_v18, %s1959_s19  ;;  %v1345_v61 = vmul.f32 %v1344_v15, %v2616_v14 }
 0x1d5   : > { %v790_v24 = vadd.f32 %v788_v60, %v782_v19  ;;  %v1324_v60 = vmul.f32 %v1322_v3, %v2574_v32  ;;  %v2667_v3 = vld [vmem:[#allocation3 + $0x6] sm:$0xff] }
 0x1d6   : > { %v800_v25 = vpop.permute.xlu1 %799  ;;  %v812_v27 = vpop.permute.xlu0 %811 }
 0x1d7   : > { %v804_v28 = vadd.f32 %v800_v25, %v790_v24  ;;  %v817_v30 = vadd.f32 %v812_v27, %v803_v20  ;;  %v1358_v24 = vstv %s2609_s24  ;;  %s2695_s24 = sld [smem:[#allocation4 + $0x61]] }
 0x1d8   : > { %1237 = vrot.lane.b32.xlu1 %v1232_v4, %s1959_s19  ;;  %1257 = vrot.lane.b32.xlu0 %v1253_v7, %s1954_s17  ;;  %v1346_v4 = vmul.f32 %v1344_v15, %v2625_v23  ;;  %v1359_v7 = vmul.f32 %v1358_v24, %v2616_v14 }
 0x1da   : > { %v814_v34 = vpop.permute.xlu1 %813  ;;  %v826_v35 = vpop.permute.xlu0 %825 }
 0x1db   : > { %v818_v31 = vadd.f32 %v814_v34, %v804_v28  ;;  %v831_v38 = vadd.f32 %v826_v35, %v817_v30 }
 0x1dc   : > { %1259 = vrot.lane.b32.xlu1 %v1254_v44, %s1954_s17  ;;  %1271 = vrot.lane.b32.xlu0 %v1267_v11, %s1955_s27  ;;  %v1360_v44 = vmul.f32 %v1358_v24, %v2625_v23  ;;  %v1373_v11 = vmul.f32 %v1372_v33, %v2616_v14 }
 0x1de   : > { %v828_v40 = vpop.permute.xlu1 %827  ;;  %v840_v41 = vpop.permute.xlu0 %839 }
 0x1df   : > { %v832_v45 = vadd.f32 %v828_v40, %v818_v31  ;;  %v845_v47 = vadd.f32 %v840_v41, %v831_v38 }
 0x1e0   : > { %1273 = vrot.lane.b32.xlu1 %v1268_v22, %s1955_s27  ;;  %1285 = vrot.lane.b32.xlu0 %v1281_v49, %s1956_s28  ;;  %v1374_v22 = vmul.f32 %v1372_v33, %v2625_v23  ;;  %v1387_v49 = vmul.f32 %v1386_v39, %v2616_v14 }
 0x1e2   : > { %v842_v51 = vpop.permute.xlu1 %841  ;;  %v854_v52 = vpop.permute.xlu0 %853 }
 0x1e3   : > { %v846_v55 = vadd.f32 %v842_v51, %v832_v45  ;;  %v859_v56 = vadd.f32 %v854_v52, %v845_v47  ;;  %v1400_v47 = vstv %s2635_s23 }
 0x1e4   : > { %1287 = vrot.lane.b32.xlu1 %v1282_v2, %s1956_s28  ;;  %1299 = vrot.lane.b32.xlu0 %v1295_v26, %s1957_s4  ;;  %v1388_v26 = vmul.f32 %v1386_v39, %v2625_v23 }
 0x1e6   : > { %v856_v59 = vpop.permute.xlu1 %855  ;;  %v868_v46 = vpop.permute.xlu0 %867 }
 0x1e7   : > { %v860_v63 = vadd.f32 %v856_v59, %v846_v55  ;;  %v873_v1 = vadd.f32 %v868_v46, %v859_v56  ;;  %v1401_v55 = vmul.f32 %v1400_v47, %v2616_v14  ;;  %v971_v56 = vmul.f32 %v970_v48, %v2412_v43 }
 0x1e8   : > { %1301 = vrot.lane.b32.xlu1 %v1296_v6, %s1957_s4  ;;  %1313 = vrot.lane.b32.xlu0 %v1309_v62, %s1958_s6 }
 0x1e9   : > { %v881_v5 = vadd.f32 %v879_v0, %v873_v1  ;;  %v1415_v0 = vmul.f32 %v1414_v58, %v2616_v14  ;;  %v972_v1 = vmul.f32 %v970_v48, %v2421_v53  ;;  %v1450_v53 = vstv %s2660_s26 }
 0x1ea   : > { %v870_v50 = vpop.permute.xlu1 %869  ;;  %v890_v8 = vpop.permute.xlu0 %889 }
 0x1eb   : > { %v874_v13 = vadd.f32 %v870_v50, %v860_v63  ;;  %v895_v54 = vadd.f32 %v890_v8, %v881_v5  ;;  %v1402_v63 = vmul.f32 %v1400_v47, %v2625_v23  ;;  %v1436_v5 = vstv %s2651_s16  ;;  %s1535_s16 = scalar_lea.sflag [#allocation6], %s2109_s14 }
 0x1ec   : > { %1315 = vrot.lane.b32.xlu1 %v1310_v9, %s1958_s6  ;;  %1327 = vrot.lane.b32.xlu0 %v1323_v10, %s1959_s19  ;;  %v1416_v10 = vmul.f32 %v1414_v58, %v2625_v23 }
 0x1ed   : > { %v882_v16 = vadd.f32 %v880_v12, %v874_v13  ;;  %v1437_v12 = vmul.f32 %v1436_v5, %v2667_v3  ;;  %v2676_v13 = vld [vmem:[#allocation3 + $0xe] sm:$0xff] }
 0x1ee   : > { %v892_v17 = vpop.permute.xlu1 %891  ;;  %v904_v18 = vpop.permute.xlu0 %903 }
 0x1ef   : > { %v896_v19 = vadd.f32 %v892_v17, %v882_v16  ;;  %v909_v20 = vadd.f32 %v904_v18, %v895_v54  ;;  %v1438_v16 = vmul.f32 %v1436_v5, %v2676_v13  ;;  %v1451_v17 = vmul.f32 %v1450_v53, %v2667_v3 }
 0x1f0   : > { %1329 = vrot.lane.b32.xlu1 %v1324_v60, %s1959_s19  ;;  %1349 = vrot.lane.b32.xlu0 %v1345_v61, %s1954_s17  ;;  %v1464_v18 = vstv %s2670_s30 }
 0x1f1   : > { %v1465_v24 = vmul.f32 %v1464_v18, %v2667_v3  ;;  %v1466_v33 = vmul.f32 %v1464_v18, %v2676_v13 }
 0x1f2   : > { %v906_v25 = vpop.permute.xlu1 %905  ;;  %v918_v27 = vpop.permute.xlu0 %917 }
 0x1f3   : > { %v910_v28 = vadd.f32 %v906_v25, %v896_v19  ;;  %v923_v30 = vadd.f32 %v918_v27, %v909_v20  ;;  %v1452_v20 = vmul.f32 %v1450_v53, %v2676_v13  ;;  %v1478_v27 = vstv %s2679_s3 }
 0x1f4   : > { %1351 = vrot.lane.b32.xlu1 %v1346_v4, %s1954_s17  ;;  %1363 = vrot.lane.b32.xlu0 %v1359_v7, %s1955_s27 }
 0x1f6   : > { %v920_v34 = vpop.permute.xlu1 %919  ;;  %v932_v35 = vpop.permute.xlu0 %931 }
 0x1f7   : > { %v924_v31 = vadd.f32 %v920_v34, %v910_v28  ;;  %v937_v38 = vadd.f32 %v932_v35, %v923_v30  ;;  %v1479_v34 = vmul.f32 %v1478_v27, %v2667_v3 }
 0x1f8   : > { %1365 = vrot.lane.b32.xlu1 %v1360_v44, %s1955_s27  ;;  %1377 = vrot.lane.b32.xlu0 %v1373_v11, %s1956_s28  ;;  %v1492_v11 = vstv %s2686_s5 }
 0x1fa   : > { %v934_v40 = vpop.permute.xlu1 %933  ;;  %v946_v41 = vpop.permute.xlu0 %945 }
 0x1fb   : > { %v938_v45 = vadd.f32 %v934_v40, %v924_v31  ;;  %v951_v51 = vadd.f32 %v946_v41, %v937_v38  ;;  %v1062_v31 = vstv %s2690_s8 }
 0x1fc   : > { %1379 = vrot.lane.b32.xlu1 %v1374_v22, %s1956_s28  ;;  %1391 = vrot.lane.b32.xlu0 %v1387_v49, %s1957_s4  ;;  %v1480_v22 = vmul.f32 %v1478_v27, %v2676_v13  ;;  %v1493_v49 = vmul.f32 %v1492_v11, %v2667_v3  ;;  %v1063_v47 = vmul.f32 %v1062_v31, %v2463_v37 }
 0x1fd   : > { %v1064_v58 = vmul.f32 %v1062_v31, %v2472_v42 }
 0x1fe   : > { %v948_v52 = vpop.permute.xlu1 %947  ;;  %v960_v2 = vpop.permute.xlu0 %959 }
 0x1ff   : > { %v965_v57 = vadd.f32 %v960_v2, %v951_v51  ;;  %v952_v59 = vadd.f32 %v948_v52, %v938_v45  ;;  %v1506_v51 = vstv %s2695_s24 }
 0x200   : > { %1393 = vrot.lane.b32.xlu1 %v1388_v26, %s1957_s4  ;;  %1405 = vrot.lane.b32.xlu0 %v1401_v55, %s1958_s6 }
 0x201   : > { %v973_v46 = vadd.f32 %v971_v56, %v965_v57  ;;  %v1494_v56 = vmul.f32 %v1492_v11, %v2676_v13  ;;  %v1507_v57 = vmul.f32 %v1506_v51, %v2667_v3 }
 0x202   : > { %v962_v6 = vpop.permute.xlu1 %961  ;;  %v982_v62 = vpop.permute.xlu0 %981 }
 0x203   : > { %v966_v43 = vadd.f32 %v962_v6, %v952_v59  ;;  %v987_v60 = vadd.f32 %v982_v62, %v973_v46  ;;  %v1508_v62 = vmul.f32 %v1506_v51, %v2676_v13 }
 0x204   : > { %1407 = vrot.lane.b32.xlu1 %v1402_v63, %s1958_s6  ;;  %1419 = vrot.lane.b32.xlu0 %v1415_v0, %s1959_s19 }
 0x205   : > { %v974_v50 = vadd.f32 %v972_v1, %v966_v43 }
 0x206   : > { %v984_v8 = vpop.permute.xlu1 %983  ;;  %v996_v9 = vpop.permute.xlu0 %995 }
 0x207   : > { %v1001_v25 = vadd.f32 %v996_v9, %v987_v60  ;;  %v988_v4 = vadd.f32 %v984_v8, %v974_v50 }
 0x208   : > { %1421 = vrot.lane.b32.xlu1 %v1416_v10, %s1959_s19  ;;  %1441 = vrot.lane.b32.xlu0 %v1437_v12, %s1954_s17 }
 0x20a   : > { %v998_v54 = vpop.permute.xlu1 %997  ;;  %v1010_v15 = vpop.permute.xlu0 %1009 }
 0x20b   : > { %v1015_v7 = vadd.f32 %v1010_v15, %v1001_v25  ;;  %v1002_v35 = vadd.f32 %v998_v54, %v988_v4 }
 0x20c   : > { %1443 = vrot.lane.b32.xlu1 %v1438_v16, %s1954_s17  ;;  %1455 = vrot.lane.b32.xlu0 %v1451_v17, %s1955_s27  ;;  %s1719_s17 = sld [smem:[#allocation4 + $0x46]] }
 0x20e   : > { %v1012_v61 = vpop.permute.xlu1 %1011  ;;  %v1024_v19 = vpop.permute.xlu0 %1023 }
 0x20f   : > { %v1029_v44 = vadd.f32 %v1024_v19, %v1015_v7  ;;  %v1016_v38 = vadd.f32 %v1012_v61, %v1002_v35 }
 0x210   : > { %1457 = vrot.lane.b32.xlu1 %v1452_v20, %s1955_s27  ;;  %1469 = vrot.lane.b32.xlu0 %v1465_v24, %s1956_s28  ;;  %s1726_s27 = sld [smem:[#allocation4 + $0x4d]] }
 0x212   : > { %v1026_v28 = vpop.permute.xlu1 %1025  ;;  %v1038_v30 = vpop.permute.xlu0 %1037  ;;  %v1154_v54 = vstv %s1719_s17 }
 0x213   : > { %v1043_v39 = vadd.f32 %v1038_v30, %v1029_v44  ;;  %v1030_v45 = vadd.f32 %v1026_v28, %v1016_v38  ;;  %v1155_v19 = vmul.f32 %v1154_v54, %v2514_v29  ;;  %v1156_v7 = vmul.f32 %v1154_v54, %v2523_v36 }
 0x214   : > { %1471 = vrot.lane.b32.xlu1 %v1466_v33, %s1956_s28  ;;  %1483 = vrot.lane.b32.xlu0 %v1479_v34, %s1957_s4  ;;  %s1733_s28 = sld [smem:[#allocation4 + $0x54]] }
 0x216   : > { %v1040_v40 = vpop.permute.xlu1 %1039  ;;  %v1052_v41 = vpop.permute.xlu0 %1051 }
 0x217   : > { %v1057_v48 = vadd.f32 %v1052_v41, %v1043_v39  ;;  %v1044_v52 = vadd.f32 %v1040_v40, %v1030_v45  ;;  %v1246_v45 = vstv %s1726_s27 }
 0x218   : > { %1485 = vrot.lane.b32.xlu1 %v1480_v22, %s1957_s4  ;;  %1497 = vrot.lane.b32.xlu0 %v1493_v49, %s1958_s6  ;;  %s1740_s4 = sld [smem:[#allocation4 + $0x5b]] }
 0x219   : > { %v1065_v2 = vadd.f32 %v1063_v47, %v1057_v48 }
 0x21a   : > { %v1054_v26 = vpop.permute.xlu1 %1053  ;;  %v1074_v55 = vpop.permute.xlu0 %1073 }
 0x21b   : > { %v1058_v59 = vadd.f32 %v1054_v26, %v1044_v52  ;;  %v1079_v1 = vadd.f32 %v1074_v55, %v1065_v2  ;;  %v1247_v26 = vmul.f32 %v1246_v45, %v2565_v21 }
 0x21c   : > { %1499 = vrot.lane.b32.xlu1 %v1494_v56, %s1958_s6  ;;  %1511 = vrot.lane.b32.xlu0 %v1507_v57, %s1959_s19  ;;  %s1643_s6 = sshll.u32 %s2109_s14, 4 }
 0x21d   : > { %v1066_v37 = vadd.f32 %v1064_v58, %v1058_v59  ;;  %s175_s25 = scalar_lea.vmem [#allocation9], %s1643_s6 }
 0x21e   : > { %v1076_v46 = vpop.permute.xlu1 %1075  ;;  %v1088_v6 = vpop.permute.xlu0 %1087  ;;  %s1548_s20 = sshll.u32 %s175_s25, 4  ;;  %s2733_s20 = int_to_ptr.vmem [resolvable:$true] %s1548_s20 }
 0x21f   : > { %v1093_v50 = vadd.f32 %v1088_v6, %v1079_v1  ;;  %v1080_v42 = vadd.f32 %v1076_v46, %v1066_v37  ;;  %v1248_v37 = vmul.f32 %v1246_v45, %v2574_v32  ;;  %s1876_s26 = scalar_lea.vmem %s2733_s20, 256 }
 0x220   : > { %1513 = vrot.lane.b32.xlu1 %v1508_v62, %s1959_s19  ;;  %s1753_s19 = sshll.u32 %s1999_s13, 8  ;;  %p1877_p13 = scmp.ne.s32.totalorder %s2733_s20, %s1876_s26 }
 0x221   : > { %s2731_s7 = scalar_lea.hbm %s2779_s2, %s1753_s19  ;;  %s1960_s13 = smov [#allocation9]  }
 0x222   : > { %v1090_v63 = vpop.permute.xlu1 %1089  ;;  %v1102_v0 = vpop.permute.xlu0 %1101  ;;  %p1878_p8 = pnand %p1877_p13, %p2793_p3  ;;  %s1880_s30 = sshll.u32 %s1960_s13, 4  ;;  %s1881_s30 = int_to_ptr.vmem [resolvable:$false] %s1880_s30 }
 0x223   : > { %v1107_v8 = vadd.f32 %v1102_v0, %v1093_v50  ;;  %v1094_v12 = vadd.f32 %v1090_v63, %v1080_v42  ;;  %s1882_s3 = scalar_lea.vmem %s1881_s30, 512  ;;  %p1883_p10 = scmp.lt.s32.totalorder %s2733_s20, %s1881_s30 }
 0x224   : > { %p1879_p9 = pneg %p1878_p8  ;;  %p1884_p1 = scmp.lt.s32.totalorder %s1882_s3, %s1876_s26 }
 0x226   : > { %v1104_v43 = vpop.permute.xlu1 %1103  ;;  %v1116_v5 = vpop.permute.xlu0 %1115  ;;  %p1885_p4 = por %p1884_p1, %p1883_p10 }
 0x227   : > { %v1121_v53 = vadd.f32 %v1116_v5, %v1107_v8  ;;  %v1108_v15 = vadd.f32 %v1104_v43, %v1094_v12 }
 0x228   : > { %p1886_p11 = pnand %p1885_p4, %p1879_p9 }
 0x22a   : > { %v1118_v9 = vpop.permute.xlu1 %1117  ;;  %v1130_v10 = vpop.permute.xlu0 %1129 }
 0x22b   : > { %v1135_v16 = vadd.f32 %v1130_v10, %v1121_v53  ;;  %v1122_v60 = vadd.f32 %v1118_v9, %v1108_v15  ;;  %v1338_v53 = vstv %s1733_s28 }
 0x22e   : > { %v1132_v17 = vpop.permute.xlu1 %1131  ;;  %v1144_v18 = vpop.permute.xlu0 %1143 }
 0x22f   : > { %v1149_v61 = vadd.f32 %v1144_v18, %v1135_v16  ;;  %v1136_v20 = vadd.f32 %v1132_v17, %v1122_v60  ;;  %v1339_v60 = vmul.f32 %v1338_v53, %v2616_v14 }
 0x231   : > { %v1157_v24 = vadd.f32 %v1155_v19, %v1149_v61 }
 0x232   : > { %v1146_v25 = vpop.permute.xlu1 %1145  ;;  %v1166_v27 = vpop.permute.xlu0 %1165 }
 0x233   : > { %v1150_v4 = vadd.f32 %v1146_v25, %v1136_v20  ;;  %v1171_v44 = vadd.f32 %v1166_v27, %v1157_v24  ;;  %v1340_v27 = vmul.f32 %v1338_v53, %v2625_v23 }
 0x235   : > { %v1158_v28 = vadd.f32 %v1156_v7, %v1150_v4 }
 0x236   : > { %v1168_v30 = vpop.permute.xlu1 %1167  ;;  %v1180_v33 = vpop.permute.xlu0 %1179 }
 0x237   : > { %v1185_v38 = vadd.f32 %v1180_v33, %v1171_v44  ;;  %v1172_v39 = vadd.f32 %v1168_v30, %v1158_v28 }
 0x23a   : > { %v1182_v34 = vpop.permute.xlu1 %1181  ;;  %v1194_v35 = vpop.permute.xlu0 %1193 }
 0x23b   : > { %v1199_v40 = vadd.f32 %v1194_v35, %v1185_v38  ;;  %v1186_v22 = vadd.f32 %v1182_v34, %v1172_v39 }
 0x23e   : > { %v1196_v11 = vpop.permute.xlu1 %1195  ;;  %v1208_v31 = vpop.permute.xlu0 %1207 }
 0x23f   : > { %v1213_v49 = vadd.f32 %v1208_v31, %v1199_v40  ;;  %v1200_v47 = vadd.f32 %v1196_v11, %v1186_v22 }
 0x242   : > { %v1210_v29 = vpop.permute.xlu1 %1209  ;;  %v1222_v41 = vpop.permute.xlu0 %1221 }
 0x243   : > { %v1227_v48 = vadd.f32 %v1222_v41, %v1213_v49  ;;  %v1214_v52 = vadd.f32 %v1210_v29, %v1200_v47  ;;  %v1430_v41 = vstv %s1740_s4 }
 0x246   : > { %v1224_v36 = vpop.permute.xlu1 %1223  ;;  %v1236_v51 = vpop.permute.xlu0 %1235 }
 0x247   : > { %v1241_v2 = vadd.f32 %v1236_v51, %v1227_v48  ;;  %v1228_v55 = vadd.f32 %v1224_v36, %v1214_v52  ;;  %v1431_v36 = vmul.f32 %v1430_v41, %v2667_v3 }
 0x249   : > { %v1249_v56 = vadd.f32 %v1247_v26, %v1241_v2 }
 0x24a   : > { %v1238_v57 = vpop.permute.xlu1 %1237  ;;  %v1258_v58 = vpop.permute.xlu0 %1257 }
 0x24b   : > { %v1242_v59 = vadd.f32 %v1238_v57, %v1228_v55  ;;  %v1263_v1 = vadd.f32 %v1258_v58, %v1249_v56  ;;  %v1432_v56 = vmul.f32 %v1430_v41, %v2676_v13 }
 0x24d   : > { %v1250_v46 = vadd.f32 %v1248_v37, %v1242_v59 }
 0x24e   : > { %v1260_v6 = vpop.permute.xlu1 %1259  ;;  %v1272_v62 = vpop.permute.xlu0 %1271 }
 0x24f   : > { %v1277_v50 = vadd.f32 %v1272_v62, %v1263_v1  ;;  %v1264_v42 = vadd.f32 %v1260_v6, %v1250_v46 }
 0x252   : > { %v1274_v63 = vpop.permute.xlu1 %1273  ;;  %v1286_v0 = vpop.permute.xlu0 %1285 }
 0x253   : > { %v1291_v8 = vadd.f32 %v1286_v0, %v1277_v50  ;;  %v1278_v10 = vadd.f32 %v1274_v63, %v1264_v42 }
 0x256   : > { %v1288_v43 = vpop.permute.xlu1 %1287  ;;  %v1300_v5 = vpop.permute.xlu0 %1299 }
 0x257   : > { %v1305_v12 = vadd.f32 %v1300_v5, %v1291_v8  ;;  %v1292_v54 = vadd.f32 %v1288_v43, %v1278_v10 }
 0x25a   : > { %v1302_v21 = vpop.permute.xlu1 %1301  ;;  %v1314_v9 = vpop.permute.xlu0 %1313 }
 0x25b   : > { %v1319_v15 = vadd.f32 %v1314_v9, %v1305_v12  ;;  %v1306_v17 = vadd.f32 %v1302_v21, %v1292_v54 }
 0x25e   : > { %v1316_v32 = vpop.permute.xlu1 %1315  ;;  %v1328_v16 = vpop.permute.xlu0 %1327 }
 0x25f   : > { %v1333_v18 = vadd.f32 %v1328_v16, %v1319_v15  ;;  %v1320_v61 = vadd.f32 %v1316_v32, %v1306_v17 }
 0x261   : > { %v1341_v19 = vadd.f32 %v1339_v60, %v1333_v18 }
 0x262   : > { %v1330_v20 = vpop.permute.xlu1 %1329  ;;  %v1350_v24 = vpop.permute.xlu0 %1349 }
 0x263   : > { %v1334_v25 = vadd.f32 %v1330_v20, %v1320_v61  ;;  %v1355_v34 = vadd.f32 %v1350_v24, %v1341_v19 }
 0x265   : > { %v1342_v4 = vadd.f32 %v1340_v27, %v1334_v25 }
 0x266   : > { %v1352_v7 = vpop.permute.xlu1 %1351  ;;  %v1364_v28 = vpop.permute.xlu0 %1363 }
 0x267   : > { %v1369_v11 = vadd.f32 %v1364_v28, %v1355_v34  ;;  %v1356_v31 = vadd.f32 %v1352_v7, %v1342_v4 }
 0x26a   : > { %v1366_v30 = vpop.permute.xlu1 %1365  ;;  %v1378_v33 = vpop.permute.xlu0 %1377 }
 0x26b   : > { %v1383_v38 = vadd.f32 %v1378_v33, %v1369_v11  ;;  %v1370_v40 = vadd.f32 %v1366_v30, %v1356_v31 }
 0x26e   : > { %v1380_v35 = vpop.permute.xlu1 %1379  ;;  %v1392_v44 = vpop.permute.xlu0 %1391 }
 0x26f   : > { %v1397_v29 = vadd.f32 %v1392_v44, %v1383_v38  ;;  %v1384_v22 = vadd.f32 %v1380_v35, %v1370_v40 }
 0x272   : > { %v1394_v14 = vpop.permute.xlu1 %1393  ;;  %v1406_v39 = vpop.permute.xlu0 %1405 }
 0x273   : > { %v1411_v49 = vadd.f32 %v1406_v39, %v1397_v29  ;;  %v1398_v47 = vadd.f32 %v1394_v14, %v1384_v22 }
 0x276   : > { %v1408_v23 = vpop.permute.xlu1 %1407  ;;  %v1420_v45 = vpop.permute.xlu0 %1419 }
 0x277   : > { %v1425_v48 = vadd.f32 %v1420_v45, %v1411_v49  ;;  %v1412_v51 = vadd.f32 %v1408_v23, %v1398_v47 }
 0x279   : > { %v1433_v52 = vadd.f32 %v1431_v36, %v1425_v48 }
 0x27a   : > { %v1422_v2 = vpop.permute.xlu1 %1421  ;;  %v1442_v26 = vpop.permute.xlu0 %1441 }
 0x27b   : > { %v1426_v55 = vadd.f32 %v1422_v2, %v1412_v51  ;;  %v1447_v6 = vadd.f32 %v1442_v26, %v1433_v52 }
 0x27d   : > { %v1434_v57 = vadd.f32 %v1432_v56, %v1426_v55 }
 0x27e   : > { %v1444_v58 = vpop.permute.xlu1 %1443  ;;  %v1456_v59 = vpop.permute.xlu0 %1455 }
 0x27f   : > { %v1461_v0 = vadd.f32 %v1456_v59, %v1447_v6  ;;  %v1448_v1 = vadd.f32 %v1444_v58, %v1434_v57 }
 0x282   : > { %v1458_v37 = vpop.permute.xlu1 %1457  ;;  %v1470_v46 = vpop.permute.xlu0 %1469 }
 0x283   : > { %v1475_v43 = vadd.f32 %v1470_v46, %v1461_v0  ;;  %v1462_v50 = vadd.f32 %v1458_v37, %v1448_v1 }
 0x286   : > { %v1472_v62 = vpop.permute.xlu1 %1471  ;;  %v1484_v63 = vpop.permute.xlu0 %1483 }
 0x287   : > { %v1489_v42 = vadd.f32 %v1484_v63, %v1475_v43  ;;  %v1476_v8 = vadd.f32 %v1472_v62, %v1462_v50 }
 0x28a   : > { %v1486_v5 = vpop.permute.xlu1 %1485  ;;  %v1498_v3 = vpop.permute.xlu0 %1497 }
 0x28b   : > { %v1503_v21 = vadd.f32 %v1498_v3, %v1489_v42  ;;  %v1490_v13 = vadd.f32 %v1486_v5, %v1476_v8 }
 0x28e   : > { %v1500_v9 = vpop.permute.xlu1 %1499  ;;  %v1512_v10 = vpop.permute.xlu0 %1511 }
 0x28f   : > { %v1517_v12 = vadd.f32 %v1512_v10, %v1503_v21  ;;  %v1504_v53 = vadd.f32 %v1500_v9, %v1490_v13 }
 0x291   : > { %v1519_v54 = vsub.f32 0.0, %v1517_v12 }
 0x292   : > { %v1514_v15 = vpop.permute.xlu1 %1513 }
 0x293   : > { %v1521_v32 = vmul.f32 1.442695, %v1519_v54  ;;  %v1518_v16 = vadd.f32 %v1514_v15, %v1504_v53 }
 0x295   : > { %1823 = vpow2.f32 %v1521_v32  ;;  %v1520_v17 = vsub.f32 0.0, %v1518_v16 }
 0x297   : > { %v1523_v18 = vmul.f32 1.442695, %v1520_v17 }
 0x299   : > { %1825 = vpow2.f32 %v1523_v18 }
 0x29f   : > { %v1824_v60 = vpop.eup %1823 }
 0x2a0   : > { %v1525_v61 = vadd.f32 1.0, %v1824_v60 }
 0x2a2   : > { %1827 = vrcp.f32 %v1525_v61 }
 0x2a3   : > { %v1826_v19 = vpop.eup %1825 }
 0x2a4   : > { %v1526_v20 = vadd.f32 1.0, %v1826_v19 }
 0x2a6   : > { %1829 = vrcp.f32 %v1526_v20 }
 0x2ac   : > { %v1828_v24 = vpop.eup %1827 }
 0x2ad   : > { %1532 = vst.msk [vmem:[%s175_s25] sm:$0xff] %vm1531_vm3, %v1828_v24 }
 0x2b0   : > { %v1830_v25 = vpop.eup %1829 }
 0x2b1   : > { %1533 = vst.msk [vmem:[%s175_s25 + $0x8] sm:$0xff] %vm1531_vm3, %v1830_v25 }
 0x2b2   : > { %1889 = shalt.err (!%p1886_p11)
}
 0x2b3   : > { %s1890_s5 = scalar_lea.hbm %s2731_s7, 256  ;;  %s1894_s17 = scalar_lea.hbm %s2779_s2, 512 }
 0x2b4   : > { %p1891_p0 = scmp.ne.s32.totalorder %s2731_s7, %s1890_s5  ;;  %p1895_p5 = scmp.lt.u32.totalorder %s2731_s7, %s2779_s2 }
 0x2b5   : > { %p1896_p12 = scmp.lt.u32.totalorder %s1894_s17, %s1890_s5  ;;  %p1898_p13 = scmp.lt.u32.totalorder %s1890_s5, %s2731_s7 }
 0x2b6   : > { %p1892_p2 = pnand %p1891_p0, %p2793_p3 }
 0x2b7   : > { %p1897_p6 = por %p1896_p12, %p1895_p5 }
 0x2b8   : > { %p1893_p7 = pneg %p1892_p2 }
 0x2b9   : > { %p1899_p8 = por %p1898_p13, %p1897_p6 }
 0x2bb   : > { %p1900_p9 = pnand %p1899_p8, %p1893_p7 }
 0x2bd   : > { %1903 = shalt.err (!%p1900_p9)
}
 0x2be   : > { %s1961_s4 = smov 128   ;;  %s1962_s6 = smov 8  }
 0x2bf   : > { %1760 = dma.vmem_to_hbm [thread:$0]  (%p2793_p3), %s2733_s20, 256, %s2731_s7, %s1535_s16, %s1961_s4, %s1961_s4, %s1962_s6  }
 0x2c0 PF: > { %s1563_s19 = sand.u32 1, %s1934_s9   ;;  %p2794_p10 = scmp.ne.s32.totalorder %s2786_s22, 0 }
 0x2c1   : > { %p2795_p1 = scmp.ge.s32.totalorder %s1946_s12, 2  ;;  %s1564_s25 = scalar_lea.sflag [#allocation6], %s1563_s19 }
 0x2c3   : > { %p1771_p4 = pnand %p2795_p1, %p2794_p10 }
 0x2c5   : > { %1929 = dma.done.wait (!%p1771_p4), %s1564_s25, 256  }
 0x2c6   : > { %1931 = vsyncadd (!%p1771_p4), %s1564_s25, 4294967040  ;;  %p16_p11 = scmp.ge.s32.totalorder %s2003_s15, 4   ;;  %s2796_s9 = smov %s1938_s10 }
 0x2c7   : > { %s2797_s10 = smov %s1942_s11  ;;  %s2798_s11 = smov %s2015_s18 }
 0x2c8   : > { %s2799_s12 = smov %s2003_s15  ;;  %18 = sbr.rel (!%p16_p11) target bundleno = 6 (0x6), region = 81 }
 0x2cf   :  { %1569 = vsyncpa [#allocation5], 1 }
 0x2d0   :  { %1571 = vsyncpa [#allocation5 + $0x1], 1 }
 0x2d1   :  { %1572 = vsyncpa [#allocation6], 1 }
 0x2d2   :  { %1574 = vsyncpa [#allocation6 + $0x1], 1 }
 0x2d3   :  { %1575 = vsyncpa [#allocation7], 1 }
 0x2d4   :  { %1577 = vsyncpa [#allocation7 + $0x1], 1 }

</bundles_post_ra>
